<compile_context>
chip_gen: v7x
topology: tpu7x:2x2x1
jax: 0.10.0
libtpu: 0.0.40
codegen_flags: <defaults>
</compile_context>

<pallas_src>
import functools

import jax
import jax.numpy as jnp
from jax.experimental import pallas as pl
from jax.experimental.pallas import tpu as pltpu


_LEAKY_SLOPE = 0.1  # nn.LeakyReLU(0.1) in the PyTorch module


def _leaky_relu(x):
    return jnp.where(x >= 0.0, x, _LEAKY_SLOPE * x)


# --------------------------------------------------------------------------- #
# Kernels
# --------------------------------------------------------------------------- #
def fused_kernel(mag_ref, pha_ref,
                 wm1, bm1, wmf1, wmf2, wm2, bm2,
                 wp1, bp1, wpf1, wpf2, wp2, bp2,
                 out_r_ref, out_i_ref, *, inv_s):
    """Whole-image kernel: conv1 + LeakyReLU, SE pool/MLP/scale, conv2,
    residual, cos/sin recombination -- no intermediate HBM round trip."""

    def branch(x, w1, b1, wf1, wf2, w2, b2):
        t = jnp.dot(w1[...], x, preferred_element_type=jnp.float32) + b1[...]
        t = _leaky_relu(t)
        avg = jnp.sum(t, axis=-1, keepdims=True) * inv_s              # (C, 1)
        h = jnp.maximum(
            jnp.dot(wf1[...], avg, preferred_element_type=jnp.float32), 0.0)
        s = jax.nn.sigmoid(
            jnp.dot(wf2[...], h, preferred_element_type=jnp.float32))  # (C, 1)
        y = jnp.dot(w2[...], t * s, preferred_element_type=jnp.float32) + b2[...]
        return x + y                                                   # residual

    mag = branch(mag_ref[0], wm1, bm1, wmf1, wmf2, wm2, bm2)
    pha = branch(pha_ref[0], wp1, bp1, wpf1, wpf2, wp2, bp2)
    out_r_ref[0] = mag * jnp.cos(pha)
    out_i_ref[0] = mag * jnp.sin(pha)


def se_pool_kernel(mag_ref, pha_ref, wm1, bm1, wp1, bp1,
                   sum_m_ref, sum_p_ref,
                   *, tiles_per_split, tile_s, s_true, masked):
    """Pass 1 (tiled path): conv1 + LeakyReLU per spatial tile; accumulate
    per-channel sums into the per-(image, core-split) output block."""
    t = pl.program_id(2)

    @pl.when(t == 0)
    def _init():
        sum_m_ref[...] = jnp.zeros_like(sum_m_ref)
        sum_p_ref[...] = jnp.zeros_like(sum_p_ref)

    if masked:  # spatial axis was padded to a multiple of 128
        start = (pl.program_id(1) * tiles_per_split + t) * tile_s
        col = jax.lax.broadcasted_iota(jnp.int32, (1, tile_s), 1) + start
        keep = col < s_true
    else:
        keep = None

    def accumulate(x, w1, b1, acc_ref):
        h = jnp.dot(w1[...], x, preferred_element_type=jnp.float32) + b1[...]
        h = _leaky_relu(h)
        if keep is not None:
            h = jnp.where(keep, h, 0.0)        # zero the padded spatial columns
        acc_ref[0, 0] += jnp.sum(h, axis=-1, keepdims=True)    # (C, 1) partial

    accumulate(mag_ref[0], wm1, bm1, sum_m_ref)
    accumulate(pha_ref[0], wp1, bp1, sum_p_ref)


def freq_main_kernel(sm_ref, sp_ref, mag_ref, pha_ref,
                     wm1, bm1, wm2, bm2,
                     wp1, bp1, wp2, bp2,
                     out_r_ref, out_i_ref):
    """Pass 2 (tiled path): conv1 + LeakyReLU, SE scale, conv2, residual and
    cos/sin recombination for one (image, spatial tile)."""

    def branch(x, s, w1, b1, w2, b2):
        t = jnp.dot(w1[...], x, preferred_element_type=jnp.float32) + b1[...]
        t = _leaky_relu(t)
        y = jnp.dot(w2[...], t * s, preferred_element_type=jnp.float32) + b2[...]
        return x + y

    mag = branch(mag_ref[0], sm_ref[0], wm1, bm1, wm2, bm2)
    pha = branch(pha_ref[0], sp_ref[0], wp1, bp1, wp2, bp2)
    out_r_ref[0] = mag * jnp.cos(pha)
    out_i_ref[0] = mag * jnp.sin(pha)


# --------------------------------------------------------------------------- #
# Wrapper
# --------------------------------------------------------------------------- #
def _vmem_budget_bytes():
    """~75% of this generation's physical VMEM (fallback: v7x-safe 64 MiB)."""
    cap = 64 << 20
    try:
        info = pltpu.get_tpu_info()
        cap = int(getattr(info, "vmem_capacity_bytes", cap) or cap)
    except Exception:
        pass
    return int(cap * 3 // 4)


def _pick_tile_s(s, target):
    """Largest multiple of 128 <= target that divides s (s is a 128-multiple)."""
    if s <= target:
        return s
    best = 128
    for cand in range(128, target + 1, 128):
        if s % cand == 0:
            best = cand
    return best


def _full_spec(shape):
    n = len(shape)
    return pl.BlockSpec(shape, lambda *_, _n=n: (0,) * _n)


def frequency_domain(x, params, *, tile_s=8192, mode="auto"):
    """x: complex64 (B, C, H, W) -> complex64 (B, C, H, W).

    mode: "auto" (default), "fused" (single-call path), "two_pass" (tiled path).
    """
    B, C, H, W = x.shape
    S = H * W
    hid = params["wmf1"].shape[0]
    f32 = jnp.float32

    # Complex decomposition stays in plain JAX (complex dtypes cannot enter a
    # Pallas ref).  NCHW -> (B, C, S) is a free reshape, no layout transpose.
    mag = jnp.abs(x).astype(f32).reshape(B, C, S)
    pha = jnp.angle(x).astype(f32).reshape(B, C, S)

    wm1, bm1, wmf1, wmf2, wm2, bm2 = (params[k] for k in
                                      ("wm1", "bm1", "wmf1", "wmf2", "wm2", "bm2"))
    wp1, bp1, wpf1, wpf2, wp2, bp2 = (params[k] for k in
                                      ("wp1", "bp1", "wpf1", "wpf2", "wp2", "bp2"))

    budget = _vmem_budget_bytes()
    w_bytes = 4 * sum(int(p.size) for p in params.values())
    plane_bytes = C * S * 4
    # ~16 resident f32 planes: 2 in + 2 out (double-buffered) + temporaries.
    fused_need = 16 * plane_bytes + w_bytes + (2 << 20)
    use_fused = (mode == "fused") or (mode == "auto" and fused_need <= budget)

    # ----------------------- fully fused single pass ----------------------- #
    if use_fused:
        img_spec = pl.BlockSpec((1, C, S), lambda b: (b, 0, 0))
        out_r, out_i = pl.pallas_call(
            functools.partial(fused_kernel, inv_s=1.0 / S),
            out_shape=(jax.ShapeDtypeStruct((B, C, S), f32),
                       jax.ShapeDtypeStruct((B, C, S), f32)),
            grid_spec=pltpu.PrefetchScalarGridSpec(
                num_scalar_prefetch=0,
                grid=(B,),
                in_specs=[img_spec, img_spec,
                          _full_spec((C, C)), _full_spec((C, 1)),
                          _full_spec((hid, C)), _full_spec((C, hid)),
                          _full_spec((C, C)), _full_spec((C, 1)),
                          _full_spec((C, C)), _full_spec((C, 1)),
                          _full_spec((hid, C)), _full_spec((C, hid)),
                          _full_spec((C, C)), _full_spec((C, 1))],
                out_specs=[img_spec, img_spec],
            ),
            compiler_params=pltpu.CompilerParams(
                dimension_semantics=("parallel",),
                vmem_limit_bytes=budget),
        )(mag, pha, wm1, bm1, wmf1, wmf2, wm2, bm2,
          wp1, bp1, wpf1, wpf2, wp2, bp2)
        return jax.lax.complex(out_r.reshape(B, C, H, W),
                               out_i.reshape(B, C, H, W))

    # ------------------------- tiled two-pass path ------------------------- #
    # Pad the spatial axis to a multiple of 128 so blocks stay (8,128)-legal
    # and pipeline-friendly instead of falling back to a full-extent block.
    s_pad = -(-S // 128) * 128
    if s_pad != S:
        pad = ((0, 0), (0, 0), (0, s_pad - S))
        mag_p, pha_p = jnp.pad(mag, pad), jnp.pad(pha, pad)
    else:
        mag_p, pha_p = mag, pha

    # Spatial tile: as large as the VMEM budget allows (amortizes the ~0.35 us
    # per-grid-step cost), capped by the caller-provided target.
    max_ts = max(128, (budget // (16 * C * 4)) // 128 * 128)
    target = max(128, (min(int(tile_s), max_ts) // 128) * 128)
    TS = _pick_tile_s(s_pad, target)
    NT = s_pad // TS
    # Split the reduction into 2 core-parallel chunks so both TensorCores stay
    # busy in pass 1 even when B == 1 (harmless on single-TC chips).
    P = 2 if (NT >= 2 and NT % 2 == 0) else 1
    TP = NT // P

    img_spec1 = pl.BlockSpec((1, C, TS),
                             lambda b, p, t, _tp=TP: (b, 0, p * _tp + t))
    sum_spec = pl.BlockSpec((1, 1, C, 1), lambda b, p, t: (b, p, 0, 0))

    sums_m, sums_p = pl.pallas_call(
        functools.partial(se_pool_kernel, tiles_per_split=TP, tile_s=TS,
                          s_true=S, masked=(s_pad != S)),
        out_shape=(jax.ShapeDtypeStruct((B, P, C, 1), f32),
                   jax.ShapeDtypeStruct((B, P, C, 1), f32)),
        grid_spec=pltpu.PrefetchScalarGridSpec(
            num_scalar_prefetch=0,
            grid=(B, P, TP),
            in_specs=[img_spec1, img_spec1,
                      _full_spec((C, C)), _full_spec((C, 1)),
                      _full_spec((C, C)), _full_spec((C, 1))],
            out_specs=[sum_spec, sum_spec],
        ),
        compiler_params=pltpu.CompilerParams(
            dimension_semantics=("parallel", "parallel", "arbitrary"),
            vmem_limit_bytes=budget),
    )(mag_p, pha_p, wm1, bm1, wp1, bp1)

    # Tiny SE MLP on pooled (B, C) vectors: negligible work, plain JAX.
    def se_scale(sums, wf1, wf2):
        avg = jnp.sum(sums, axis=(1, 3)) / S                         # (B, C)
        h = jnp.maximum(avg @ wf1.T, 0.0)                            # (B, hid)
        return jax.nn.sigmoid(h @ wf2.T).reshape(B, C, 1)            # (B, C, 1)

    scale_m = se_scale(sums_m, wmf1, wmf2)
    scale_p = se_scale(sums_p, wpf1, wpf2)

    img_spec2 = pl.BlockSpec((1, C, TS), lambda b, t: (b, 0, t))
    scale_spec = pl.BlockSpec((1, C, 1), lambda b, t: (b, 0, 0))

    out_r, out_i = pl.pallas_call(
        freq_main_kernel,
        out_shape=(jax.ShapeDtypeStruct((B, C, s_pad), f32),
                   jax.ShapeDtypeStruct((B, C, s_pad), f32)),
        grid_spec=pltpu.PrefetchScalarGridSpec(
            num_scalar_prefetch=0,
            grid=(B, NT),
            in_specs=[scale_spec, scale_spec, img_spec2, img_spec2,
                      _full_spec((C, C)), _full_spec((C, 1)),
                      _full_spec((C, C)), _full_spec((C, 1)),
                      _full_spec((C, C)), _full_spec((C, 1)),
                      _full_spec((C, C)), _full_spec((C, 1))],
            out_specs=[img_spec2, img_spec2],
        ),
        compiler_params=pltpu.CompilerParams(
            dimension_semantics=("parallel", "parallel"),
            vmem_limit_bytes=budget),
    )(scale_m, scale_p, mag_p, pha_p,
      wm1, bm1, wm2, bm2, wp1, bp1, wp2, bp2)

    out_r = out_r[:, :, :S].reshape(B, C, H, W)
    out_i = out_i[:, :, :S].reshape(B, C, H, W)
    return jax.lax.complex(out_r, out_i)


# --------------------------------------------------------------------------- #
# Parameters & pure-JAX reference
# --------------------------------------------------------------------------- #
def init_params(key, nc, reduction=16):
    """Deterministic synthetic parameters matching FrequencyDomain(nc).

    Conv 1x1 weights: (C_out, C_in); biases: (C, 1).
    SE fc1: (hid, C); SE fc2: (C, hid)  (bias-free, like the PyTorch SELayer).
    """
    hid = max(nc // reduction, 1)
    ks = jax.random.split(key, 12)
    n = lambda k, shape, s: jax.random.normal(k, shape, jnp.float32) * s
    return {
        "wm1": n(ks[0], (nc, nc), 0.1), "bm1": n(ks[1], (nc, 1), 0.05),
        "wmf1": n(ks[2], (hid, nc), 0.2), "wmf2": n(ks[3], (nc, hid), 0.2),
        "wm2": n(ks[4], (nc, nc), 0.1), "bm2": n(ks[5], (nc, 1), 0.05),
        "wp1": n(ks[6], (nc, nc), 0.1), "bp1": n(ks[7], (nc, 1), 0.05),
        "wpf1": n(ks[8], (hid, nc), 0.2), "wpf2": n(ks[9], (nc, hid), 0.2),
        "wp2": n(ks[10], (nc, nc), 0.1), "bp2": n(ks[11], (nc, 1), 0.05),
    }


def frequency_domain_ref(x, params):
    """Pure-JAX reference (mirrors the PyTorch forward) for verification."""
    def branch(a, w1, b1, wf1, wf2, w2, b2):
        t = jnp.einsum("oc,bchw->bohw", w1, a) + b1[:, 0][None, :, None, None]
        t = jnp.where(t >= 0, t, _LEAKY_SLOPE * t)
        avg = jnp.mean(t, axis=(2, 3))                       # (B, C)
        h = jnp.maximum(jnp.einsum("hc,bc->bh", wf1, avg), 0.0)
        s = jax.nn.sigmoid(jnp.einsum("ch,bh->bc", wf2, h))  # (B, C)
        t = t * s[:, :, None, None]
        y = jnp.einsum("oc,bchw->bohw", w2, t) + b2[:, 0][None, :, None, None]
        return a + y

    mag = jnp.abs(x).astype(jnp.float32)
    pha = jnp.angle(x).astype(jnp.float32)
    mag = branch(mag, params["wm1"], params["bm1"], params["wmf1"],
                 params["wmf2"], params["wm2"], params["bm2"])
    pha = branch(pha, params["wp1"], params["bp1"], params["wpf1"],
                 params["wpf2"], params["wp2"], params["bp2"])
    return jax.lax.complex(mag * jnp.cos(pha), mag * jnp.sin(pha))


if __name__ == "__main__":
    key = jax.random.PRNGKey(0)
    B, C, H, W = 2, 32, 16, 16          # nc=32 -> SE hidden = nc//16 = 2
    k1, k2, k3 = jax.random.split(key, 3)
    xr = jax.random.normal(k1, (B, C, H, W), jnp.float32)
    xi = jax.random.normal(k2, (B, C, H, W), jnp.float32)
    x = jax.lax.complex(xr, xi)
    params = init_params(k3, C)
    ref = frequency_domain_ref(x, params)

    # 1) auto path -> fully fused single pallas_call (image fits VMEM budget)
    out = jax.block_until_ready(frequency_domain(x, params))
    assert out.shape == (B, C, H, W) and out.dtype == jnp.complex64
    assert jnp.allclose(out, ref, rtol=2e-3, atol=2e-3), "fused path mismatch"

    # 2) tiled two-pass path (forced), exercising the megacore split in pass 1
    out2 = jax.block_until_ready(
        frequency_domain(x, params, mode="two_pass", tile_s=128))
    assert jnp.allclose(out2, ref, rtol=2e-3, atol=2e-3), "tiled path mismatch"

    # 3) non-128-multiple spatial size -> padded + masked SE pool (tiled path)
    H2 = W2 = 10
    x3 = jax.lax.complex(
        jax.random.normal(k1, (1, C, H2, W2), jnp.float32),
        jax.random.normal(k2, (1, C, H2, W2), jnp.float32))
    out3 = jax.block_until_ready(frequency_domain(x3, params, mode="two_pass"))
    ref3 = frequency_domain_ref(x3, params)
    assert jnp.allclose(out3, ref3, rtol=2e-3, atol=2e-3), "padded path mismatch"

    print("KERNEL_OK")
</pallas_src>

<mosaic_0001>
module attributes {stable_mosaic.version = 11 : i64} {
  func.func @fused_kernel(%arg0: i32, %arg1: memref<1x32x256xf32, #tpu.memory_space<vmem>>, %arg2: memref<1x32x256xf32, #tpu.memory_space<vmem>>, %arg3: memref<32x32xf32, #tpu.memory_space<vmem>>, %arg4: memref<32x1xf32, #tpu.memory_space<vmem>>, %arg5: memref<2x32xf32, #tpu.memory_space<vmem>>, %arg6: memref<32x2xf32, #tpu.memory_space<vmem>>, %arg7: memref<32x32xf32, #tpu.memory_space<vmem>>, %arg8: memref<32x1xf32, #tpu.memory_space<vmem>>, %arg9: memref<32x32xf32, #tpu.memory_space<vmem>>, %arg10: memref<32x1xf32, #tpu.memory_space<vmem>>, %arg11: memref<2x32xf32, #tpu.memory_space<vmem>>, %arg12: memref<32x2xf32, #tpu.memory_space<vmem>>, %arg13: memref<32x32xf32, #tpu.memory_space<vmem>>, %arg14: memref<32x1xf32, #tpu.memory_space<vmem>>, %arg15: memref<1x32x256xf32, #tpu.memory_space<vmem>>, %arg16: memref<1x32x256xf32, #tpu.memory_space<vmem>>) attributes {dimension_semantics = [#tpu.dimension_semantics<parallel>], iteration_bounds = array<i64: 2>, scalar_prefetch = 0 : i64, scratch_operands = 0 : i64, tpu.core_type = #tpu.core_type<tc>, window_params = [{transform_indices = @transform_0, window_bounds = array<i64: 1, 32, 256>}, {transform_indices = @transform_1, window_bounds = array<i64: 1, 32, 256>}, {pipeline_mode = #tpu.pipeline_mode<synchronous>, transform_indices = @transform_2, window_bounds = array<i64: 32, 32>}, {pipeline_mode = #tpu.pipeline_mode<synchronous>, transform_indices = @transform_3, window_bounds = array<i64: 32, 1>}, {pipeline_mode = #tpu.pipeline_mode<synchronous>, transform_indices = @transform_4, window_bounds = array<i64: 2, 32>}, {pipeline_mode = #tpu.pipeline_mode<synchronous>, transform_indices = @transform_5, window_bounds = array<i64: 32, 2>}, {pipeline_mode = #tpu.pipeline_mode<synchronous>, transform_indices = @transform_6, window_bounds = array<i64: 32, 32>}, {pipeline_mode = #tpu.pipeline_mode<synchronous>, transform_indices = @transform_7, window_bounds = array<i64: 32, 1>}, {pipeline_mode = #tpu.pipeline_mode<synchronous>, transform_indices = @transform_8, window_bounds = array<i64: 32, 32>}, {pipeline_mode = #tpu.pipeline_mode<synchronous>, transform_indices = @transform_9, window_bounds = array<i64: 32, 1>}, {pipeline_mode = #tpu.pipeline_mode<synchronous>, transform_indices = @transform_10, window_bounds = array<i64: 2, 32>}, {pipeline_mode = #tpu.pipeline_mode<synchronous>, transform_indices = @transform_11, window_bounds = array<i64: 32, 2>}, {pipeline_mode = #tpu.pipeline_mode<synchronous>, transform_indices = @transform_12, window_bounds = array<i64: 32, 32>}, {pipeline_mode = #tpu.pipeline_mode<synchronous>, transform_indices = @transform_13, window_bounds = array<i64: 32, 1>}, {transform_indices = @transform_14, window_bounds = array<i64: 1, 32, 256>}, {transform_indices = @transform_15, window_bounds = array<i64: 1, 32, 256>}]} {
    %c0 = arith.constant 0 : index
    %c0_0 = arith.constant 0 : index
    %c0_1 = arith.constant 0 : index
    %0 = vector.load %arg1[%c0, %c0_0, %c0_1] : memref<1x32x256xf32, #tpu.memory_space<vmem>>, vector<1x32x256xf32>
    %1 = vector.shape_cast %0 : vector<1x32x256xf32> to vector<32x256xf32>
    %c0_2 = arith.constant 0 : index
    %c0_3 = arith.constant 0 : index
    %2 = vector.load %arg3[%c0_2, %c0_3] : memref<32x32xf32, #tpu.memory_space<vmem>>, vector<32x32xf32>
    %cst = arith.constant dense<0.000000e+00> : vector<32x256xf32>
    %3 = tpu.matmul %2, %1, %cst {dimension_numbers = #tpu.dot_dimension_numbers<[1], [0], [0], [1], [0, 0, 1, 1], [], []>} : vector<32x32xf32>, vector<32x256xf32>, vector<32x256xf32> -> vector<32x256xf32>
    %c0_4 = arith.constant 0 : index
    %c0_5 = arith.constant 0 : index
    %4 = vector.load %arg4[%c0_4, %c0_5] : memref<32x1xf32, #tpu.memory_space<vmem>>, vector<32x1xf32>
    %5 = vector.broadcast %4 : vector<32x1xf32> to vector<32x256xf32>
    %6 = arith.addf %3, %5 : vector<32x256xf32>
    %cst_6 = arith.constant 0.000000e+00 : f32
    %7 = vector.broadcast %cst_6 : f32 to vector<32x256xf32>
    %8 = arith.cmpf oge, %6, %7 : vector<32x256xf32>
    %cst_7 = arith.constant 1.000000e-01 : f32
    %9 = vector.broadcast %cst_7 : f32 to vector<32x256xf32>
    %10 = arith.mulf %9, %6 : vector<32x256xf32>
    %11 = arith.select %8, %6, %10 : vector<32x256xi1>, vector<32x256xf32>
    %cst_8 = arith.constant dense<0.000000e+00> : vector<32xf32>
    %12 = vector.multi_reduction <add>, %11, %cst_8 [1] : vector<32x256xf32> to vector<32xf32>
    %13 = vector.shape_cast %12 : vector<32xf32> to vector<32x1xf32>
    %cst_9 = arith.constant 3.906250e-03 : f32
    %14 = vector.broadcast %cst_9 : f32 to vector<32x1xf32>
    %15 = arith.mulf %13, %14 : vector<32x1xf32>
    %c0_10 = arith.constant 0 : index
    %c0_11 = arith.constant 0 : index
    %16 = vector.load %arg5[%c0_10, %c0_11] : memref<2x32xf32, #tpu.memory_space<vmem>>, vector<2x32xf32>
    %cst_12 = arith.constant dense<0.000000e+00> : vector<2x1xf32>
    %17 = tpu.matmul %16, %15, %cst_12 {dimension_numbers = #tpu.dot_dimension_numbers<[1], [0], [0], [1], [0, 0, 1, 1], [], []>} : vector<2x32xf32>, vector<32x1xf32>, vector<2x1xf32> -> vector<2x1xf32>
    %cst_13 = arith.constant 0.000000e+00 : f32
    %18 = vector.broadcast %cst_13 : f32 to vector<2x1xf32>
    %19 = arith.maximumf %17, %18 : vector<2x1xf32>
    %c0_14 = arith.constant 0 : index
    %c0_15 = arith.constant 0 : index
    %20 = vector.load %arg6[%c0_14, %c0_15] : memref<32x2xf32, #tpu.memory_space<vmem>>, vector<32x2xf32>
    %cst_16 = arith.constant dense<0.000000e+00> : vector<32x1xf32>
    %21 = tpu.matmul %20, %19, %cst_16 {dimension_numbers = #tpu.dot_dimension_numbers<[1], [0], [0], [1], [0, 0, 1, 1], [], []>} : vector<32x2xf32>, vector<2x1xf32>, vector<32x1xf32> -> vector<32x1xf32>
    %22 = arith.negf %21 : vector<32x1xf32>
    %23 = math.exp %22 : vector<32x1xf32>
    %cst_17 = arith.constant 1.000000e+00 : f32
    %24 = vector.broadcast %cst_17 : f32 to vector<32x1xf32>
    %25 = arith.addf %24, %23 : vector<32x1xf32>
    %26 = arith.divf %24, %25 : vector<32x1xf32>
    %c0_18 = arith.constant 0 : index
    %c0_19 = arith.constant 0 : index
    %27 = vector.load %arg7[%c0_18, %c0_19] : memref<32x32xf32, #tpu.memory_space<vmem>>, vector<32x32xf32>
    %28 = vector.broadcast %26 : vector<32x1xf32> to vector<32x256xf32>
    %29 = arith.mulf %11, %28 : vector<32x256xf32>
    %cst_20 = arith.constant dense<0.000000e+00> : vector<32x256xf32>
    %30 = tpu.matmul %27, %29, %cst_20 {dimension_numbers = #tpu.dot_dimension_numbers<[1], [0], [0], [1], [0, 0, 1, 1], [], []>} : vector<32x32xf32>, vector<32x256xf32>, vector<32x256xf32> -> vector<32x256xf32>
    %c0_21 = arith.constant 0 : index
    %c0_22 = arith.constant 0 : index
    %31 = vector.load %arg8[%c0_21, %c0_22] : memref<32x1xf32, #tpu.memory_space<vmem>>, vector<32x1xf32>
    %32 = vector.broadcast %31 : vector<32x1xf32> to vector<32x256xf32>
    %33 = arith.addf %30, %32 : vector<32x256xf32>
    %34 = arith.addf %1, %33 : vector<32x256xf32>
    %c0_23 = arith.constant 0 : index
    %c0_24 = arith.constant 0 : index
    %c0_25 = arith.constant 0 : index
    %35 = vector.load %arg2[%c0_23, %c0_24, %c0_25] : memref<1x32x256xf32, #tpu.memory_space<vmem>>, vector<1x32x256xf32>
    %36 = vector.shape_cast %35 : vector<1x32x256xf32> to vector<32x256xf32>
    %c0_26 = arith.constant 0 : index
    %c0_27 = arith.constant 0 : index
    %37 = vector.load %arg9[%c0_26, %c0_27] : memref<32x32xf32, #tpu.memory_space<vmem>>, vector<32x32xf32>
    %cst_28 = arith.constant dense<0.000000e+00> : vector<32x256xf32>
    %38 = tpu.matmul %37, %36, %cst_28 {dimension_numbers = #tpu.dot_dimension_numbers<[1], [0], [0], [1], [0, 0, 1, 1], [], []>} : vector<32x32xf32>, vector<32x256xf32>, vector<32x256xf32> -> vector<32x256xf32>
    %c0_29 = arith.constant 0 : index
    %c0_30 = arith.constant 0 : index
    %39 = vector.load %arg10[%c0_29, %c0_30] : memref<32x1xf32, #tpu.memory_space<vmem>>, vector<32x1xf32>
    %40 = vector.broadcast %39 : vector<32x1xf32> to vector<32x256xf32>
    %41 = arith.addf %38, %40 : vector<32x256xf32>
    %cst_31 = arith.constant 0.000000e+00 : f32
    %42 = vector.broadcast %cst_31 : f32 to vector<32x256xf32>
    %43 = arith.cmpf oge, %41, %42 : vector<32x256xf32>
    %cst_32 = arith.constant 1.000000e-01 : f32
    %44 = vector.broadcast %cst_32 : f32 to vector<32x256xf32>
    %45 = arith.mulf %44, %41 : vector<32x256xf32>
    %46 = arith.select %43, %41, %45 : vector<32x256xi1>, vector<32x256xf32>
    %cst_33 = arith.constant dense<0.000000e+00> : vector<32xf32>
    %47 = vector.multi_reduction <add>, %46, %cst_33 [1] : vector<32x256xf32> to vector<32xf32>
    %48 = vector.shape_cast %47 : vector<32xf32> to vector<32x1xf32>
    %cst_34 = arith.constant 3.906250e-03 : f32
    %49 = vector.broadcast %cst_34 : f32 to vector<32x1xf32>
    %50 = arith.mulf %48, %49 : vector<32x1xf32>
    %c0_35 = arith.constant 0 : index
    %c0_36 = arith.constant 0 : index
    %51 = vector.load %arg11[%c0_35, %c0_36] : memref<2x32xf32, #tpu.memory_space<vmem>>, vector<2x32xf32>
    %cst_37 = arith.constant dense<0.000000e+00> : vector<2x1xf32>
    %52 = tpu.matmul %51, %50, %cst_37 {dimension_numbers = #tpu.dot_dimension_numbers<[1], [0], [0], [1], [0, 0, 1, 1], [], []>} : vector<2x32xf32>, vector<32x1xf32>, vector<2x1xf32> -> vector<2x1xf32>
    %cst_38 = arith.constant 0.000000e+00 : f32
    %53 = vector.broadcast %cst_38 : f32 to vector<2x1xf32>
    %54 = arith.maximumf %52, %53 : vector<2x1xf32>
    %c0_39 = arith.constant 0 : index
    %c0_40 = arith.constant 0 : index
    %55 = vector.load %arg12[%c0_39, %c0_40] : memref<32x2xf32, #tpu.memory_space<vmem>>, vector<32x2xf32>
    %cst_41 = arith.constant dense<0.000000e+00> : vector<32x1xf32>
    %56 = tpu.matmul %55, %54, %cst_41 {dimension_numbers = #tpu.dot_dimension_numbers<[1], [0], [0], [1], [0, 0, 1, 1], [], []>} : vector<32x2xf32>, vector<2x1xf32>, vector<32x1xf32> -> vector<32x1xf32>
    %57 = arith.negf %56 : vector<32x1xf32>
    %58 = math.exp %57 : vector<32x1xf32>
    %cst_42 = arith.constant 1.000000e+00 : f32
    %59 = vector.broadcast %cst_42 : f32 to vector<32x1xf32>
    %60 = arith.addf %59, %58 : vector<32x1xf32>
    %61 = arith.divf %59, %60 : vector<32x1xf32>
    %c0_43 = arith.constant 0 : index
    %c0_44 = arith.constant 0 : index
    %62 = vector.load %arg13[%c0_43, %c0_44] : memref<32x32xf32, #tpu.memory_space<vmem>>, vector<32x32xf32>
    %63 = vector.broadcast %61 : vector<32x1xf32> to vector<32x256xf32>
    %64 = arith.mulf %46, %63 : vector<32x256xf32>
    %cst_45 = arith.constant dense<0.000000e+00> : vector<32x256xf32>
    %65 = tpu.matmul %62, %64, %cst_45 {dimension_numbers = #tpu.dot_dimension_numbers<[1], [0], [0], [1], [0, 0, 1, 1], [], []>} : vector<32x32xf32>, vector<32x256xf32>, vector<32x256xf32> -> vector<32x256xf32>
    %c0_46 = arith.constant 0 : index
    %c0_47 = arith.constant 0 : index
    %66 = vector.load %arg14[%c0_46, %c0_47] : memref<32x1xf32, #tpu.memory_space<vmem>>, vector<32x1xf32>
    %67 = vector.broadcast %66 : vector<32x1xf32> to vector<32x256xf32>
    %68 = arith.addf %65, %67 : vector<32x256xf32>
    %69 = arith.addf %36, %68 : vector<32x256xf32>
    %70 = math.cos %69 : vector<32x256xf32>
    %71 = arith.mulf %34, %70 : vector<32x256xf32>
    %c0_48 = arith.constant 0 : index
    %c0_49 = arith.constant 0 : index
    %c0_50 = arith.constant 0 : index
    %72 = vector.load %arg15[%c0_48, %c0_49, %c0_50] : memref<1x32x256xf32, #tpu.memory_space<vmem>>, vector<1x32x256xf32>
    %73 = vector.shape_cast %72 : vector<1x32x256xf32> to vector<32x256xf32>
    %74 = vector.shape_cast %71 : vector<32x256xf32> to vector<1x32x256xf32>
    tpu.vector_store %arg15[%c0_48, %c0_49, %c0_50], %74 {strides = array<i32>} : memref<1x32x256xf32, #tpu.memory_space<vmem>>, vector<1x32x256xf32>,
    %75 = math.sin %69 : vector<32x256xf32>
    %76 = arith.mulf %34, %75 : vector<32x256xf32>
    %c0_51 = arith.constant 0 : index
    %c0_52 = arith.constant 0 : index
    %c0_53 = arith.constant 0 : index
    %77 = vector.load %arg16[%c0_51, %c0_52, %c0_53] : memref<1x32x256xf32, #tpu.memory_space<vmem>>, vector<1x32x256xf32>
    %78 = vector.shape_cast %77 : vector<1x32x256xf32> to vector<32x256xf32>
    %79 = vector.shape_cast %76 : vector<32x256xf32> to vector<1x32x256xf32>
    tpu.vector_store %arg16[%c0_51, %c0_52, %c0_53], %79 {strides = array<i32>} : memref<1x32x256xf32, #tpu.memory_space<vmem>>, vector<1x32x256xf32>,
    return
  }
  func.func @transform_0(%arg0: i32) -> (i32, i32, i32) {
    %c0_i32 = arith.constant 0 : i32
    %c0_i32_0 = arith.constant 0 : i32
    %c0_i32_1 = arith.constant 0 : i32
    return %arg0, %c0_i32, %c0_i32_0 : i32, i32, i32
  }
  func.func @transform_1(%arg0: i32) -> (i32, i32, i32) {
    %c0_i32 = arith.constant 0 : i32
    %c0_i32_0 = arith.constant 0 : i32
    %c0_i32_1 = arith.constant 0 : i32
    return %arg0, %c0_i32, %c0_i32_0 : i32, i32, i32
  }
  func.func @transform_2(%arg0: i32) -> (i32, i32) {
    %c0_i32 = arith.constant 0 : i32
    %c0_i32_0 = arith.constant 0 : i32
    %c0_i32_1 = arith.constant 0 : i32
    return %c0_i32, %c0_i32_0 : i32, i32
  }
  func.func @transform_3(%arg0: i32) -> (i32, i32) {
    %c0_i32 = arith.constant 0 : i32
    %c0_i32_0 = arith.constant 0 : i32
    %c0_i32_1 = arith.constant 0 : i32
    return %c0_i32, %c0_i32_0 : i32, i32
  }
  func.func @transform_4(%arg0: i32) -> (i32, i32) {
    %c0_i32 = arith.constant 0 : i32
    %c0_i32_0 = arith.constant 0 : i32
    %c0_i32_1 = arith.constant 0 : i32
    return %c0_i32, %c0_i32_0 : i32, i32
  }
  func.func @transform_5(%arg0: i32) -> (i32, i32) {
    %c0_i32 = arith.constant 0 : i32
    %c0_i32_0 = arith.constant 0 : i32
    %c0_i32_1 = arith.constant 0 : i32
    return %c0_i32, %c0_i32_0 : i32, i32
  }
  func.func @transform_6(%arg0: i32) -> (i32, i32) {
    %c0_i32 = arith.constant 0 : i32
    %c0_i32_0 = arith.constant 0 : i32
    %c0_i32_1 = arith.constant 0 : i32
    return %c0_i32, %c0_i32_0 : i32, i32
  }
  func.func @transform_7(%arg0: i32) -> (i32, i32) {
    %c0_i32 = arith.constant 0 : i32
    %c0_i32_0 = arith.constant 0 : i32
    %c0_i32_1 = arith.constant 0 : i32
    return %c0_i32, %c0_i32_0 : i32, i32
  }
  func.func @transform_8(%arg0: i32) -> (i32, i32) {
    %c0_i32 = arith.constant 0 : i32
    %c0_i32_0 = arith.constant 0 : i32
    %c0_i32_1 = arith.constant 0 : i32
    return %c0_i32, %c0_i32_0 : i32, i32
  }
  func.func @transform_9(%arg0: i32) -> (i32, i32) {
    %c0_i32 = arith.constant 0 : i32
    %c0_i32_0 = arith.constant 0 : i32
    %c0_i32_1 = arith.constant 0 : i32
    return %c0_i32, %c0_i32_0 : i32, i32
  }
  func.func @transform_10(%arg0: i32) -> (i32, i32) {
    %c0_i32 = arith.constant 0 : i32
    %c0_i32_0 = arith.constant 0 : i32
    %c0_i32_1 = arith.constant 0 : i32
    return %c0_i32, %c0_i32_0 : i32, i32
  }
  func.func @transform_11(%arg0: i32) -> (i32, i32) {
    %c0_i32 = arith.constant 0 : i32
    %c0_i32_0 = arith.constant 0 : i32
    %c0_i32_1 = arith.constant 0 : i32
    return %c0_i32, %c0_i32_0 : i32, i32
  }
  func.func @transform_12(%arg0: i32) -> (i32, i32) {
    %c0_i32 = arith.constant 0 : i32
    %c0_i32_0 = arith.constant 0 : i32
    %c0_i32_1 = arith.constant 0 : i32
    return %c0_i32, %c0_i32_0 : i32, i32
  }
  func.func @transform_13(%arg0: i32) -> (i32, i32) {
    %c0_i32 = arith.constant 0 : i32
    %c0_i32_0 = arith.constant 0 : i32
    %c0_i32_1 = arith.constant 0 : i32
    return %c0_i32, %c0_i32_0 : i32, i32
  }
  func.func @transform_14(%arg0: i32) -> (i32, i32, i32) {
    %c0_i32 = arith.constant 0 : i32
    %c0_i32_0 = arith.constant 0 : i32
    %c0_i32_1 = arith.constant 0 : i32
    return %arg0, %c0_i32, %c0_i32_0 : i32, i32, i32
  }
  func.func @transform_15(%arg0: i32) -> (i32, i32, i32) {
    %c0_i32 = arith.constant 0 : i32
    %c0_i32_0 = arith.constant 0 : i32
    %c0_i32_1 = arith.constant 0 : i32
    return %arg0, %c0_i32, %c0_i32_0 : i32, i32, i32
  }
}

</mosaic_0001>

<bundles_post_ra>
// kernel: tpu_custom_call.1
= control target key start
LH: loop header
LB: loop body
LE: loop exit
PB: predicated region body
PF: predicated region fallthrough
CT: control target
= control target key end

     0   :  { %s5565_s0 = inlined_call_operand.vmem [shape: f32[2,32,256], index: 0, kind: input, shape index: {}]   ;;  %s5566_s1 = inlined_call_operand.hbm [shape: f32[2,32,256], index: 1, kind: input, shape index: {}]   ;;  %s5567_s2 = inlined_call_operand.vmem [shape: f32[32,32], index: 2, kind: input, shape index: {}]   ;;  %s5568_s3 = inlined_call_operand.vmem [shape: f32[32,1], index: 3, kind: input, shape index: {}]   ;;  %s5569_s4 = inlined_call_operand.vmem [shape: f32[2,32], index: 4, kind: input, shape index: {}]   ;;  %s5570_s5 = inlined_call_operand.vmem [shape: f32[32,2], index: 5, kind: input, shape index: {}]   ;;  %s5571_s6 = inlined_call_operand.vmem [shape: f32[32,32], index: 6, kind: input, shape index: {}]   ;;  %s5572_s7 = inlined_call_operand.vmem [shape: f32[32,1], index: 7, kind: input, shape index: {}]   ;;  %s5573_s8 = inlined_call_operand.vmem [shape: f32[32,32], index: 8, kind: input, shape index: {}]   ;;  %s5574_s9 = inlined_call_operand.vmem [shape: f32[32,1], index: 9, kind: input, shape index: {}]   ;;  %s5575_s10 = inlined_call_operand.vmem [shape: f32[2,32], index: 10, kind: input, shape index: {}]   ;;  %s5576_s11 = inlined_call_operand.vmem [shape: f32[32,2], index: 11, kind: input, shape index: {}]   ;;  %s5577_s12 = inlined_call_operand.hbm [shape: f32[32,32], index: 12, kind: input, shape index: {}]   ;;  %s5578_s13 = inlined_call_operand.vmem [shape: f32[32,1], index: 13, kind: input, shape index: {}]   ;;  %s5579_s14 = inlined_call_operand.hbm [shape: f32[2,32,256], index: 14, kind: output, shape index: {0}]   ;;  %s5580_s15 = inlined_call_operand.hbm [shape: f32[2,32,256], index: 15, kind: output, shape index: {1}]  }
   0x1   :  { %5593 = sst [smem:[#allocation17_spill]] %s5565_s0 }
   0x2   :  { %5594 = sst [smem:[#allocation18_spill]] %s5566_s1 }
   0x3   :  { %5595 = sst [smem:[#allocation19_spill]] %s5567_s2 }
   0x4   :  { %5596 = sst [smem:[#allocation20_spill]] %s5568_s3 }
   0x5   :  { %5597 = sst [smem:[#allocation21_spill]] %s5569_s4 }
   0x6   :  { %5598 = sst [smem:[#allocation22_spill]] %s5571_s6 }
   0x7   :  { %5599 = sst [smem:[#allocation23_spill]] %s5572_s7 }
   0x8   :  { %5600 = sst [smem:[#allocation24_spill]] %s5578_s13 }
   0x9   :  { %5601 = sst [smem:[#allocation25_spill]] %s5579_s14 }
   0xa   :  { %5602 = sst [smem:[#allocation26_spill]] %s5580_s15 }
   0xb   :  { %21 = vsyncpa [#allocation3], 0 }
   0xc   :  { %23 = vsyncpa [#allocation3 + $0x1], 0 }
   0xd   :  { %24 = vsyncpa [#allocation6], 0 }
   0xe   :  { %25 = vsyncpa [#allocation4], 0 }
   0xf   :  { %27 = vsyncpa [#allocation4 + $0x1], 0 }
  0x10   :  { %28 = vsyncpa [#allocation9], 0 }
  0x11   :  { %30 = vsyncpa [#allocation9 + $0x1], 0  ;;  %s4181_s18 = smov 0   ;;  %s4183_s19 = smov 0  }
  0x12   :  { %s4185_s20 = smov 0   ;;  %s4187_s21 = smov 0  }
  0x13 LB: > { %5603 = sst [smem:[#allocation14_spill]] %s4067_s18  ;;  %s4202_s22 = sadd.s32 4294967295, %s4079_s21   ;;  %s4079_s21 = sphi %s4187_s21, %s5644_s21   ;;  %s4075_s20 = sphi %s4185_s20, %s5647_s20   ;;  %s4071_s19 = sphi %s4183_s19, %s5646_s19   ;;  %s4067_s18 = sphi %s4181_s18, %s5645_s18  }
  0x14   : > { %s3502_s23 = sadd.s32 4294967294, %s4079_s21   ;;  %p82_p0 = scmp.ne.s32.totalorder %s4071_s19, %s4067_s18 }
  0x15   : > { %p5588_p1 = scmp.eq.s32.totalorder %s4202_s22, 0  ;;  %p364_p3 = scmp.eq.s32.totalorder %s3502_s23, 1 }
  0x16   : > { %p3503_p5 = scmp.ge.s32.totalorder %s4079_s21, 1  ;;  %p397_p7 = scmp.lt.s32.totalorder %s4079_s21, 3 }
  0x17   : > { %p4211_p4 = por %p5588_p1, %p82_p0  ;;  %p4216_p6 = por %p364_p3, %p82_p0 }
  0x18   : > { %p4221_p8 = pnand %p3503_p5, %p397_p7  ;;  %s4081_s27 = smov [#allocation5]  }
  0x19   : > { %s5604_s24 = scalar_select %p4211_p4, 1, 0 }
  0x1a   : > { %s5605_s25 = scalar_select %p4216_p6, 1, 0 }
  0x1b   : > { %s5607_s26 = scalar_select %p4221_p8, 1, 0 }
  0x1c   : > { %5606 = sst [smem:[#allocation15_spill]] %s5605_s25  ;;  %s439_s28 = sshll.u32 %s4081_s27, 4  ;;  %s4225_s28 = int_to_ptr.vmem [resolvable:$true] %s439_s28 }
  0x1d   : > { %p3772_p9 = pneg %p4221_p8  ;;  %s4237_s30 = sadd.s32 1, %s4079_s21  }
  0x1e   : > { %5609 = sst [smem:[#allocation16_spill]] %s4237_s30  ;;  %s69_s16 = sadd.s32 1, %s4075_s20 }
  0x1f   : > { %p4232_p11 = pnand %p3772_p9, %p5588_p1  ;;  %s66_s17 = ssub.s32 %s4079_s21, %s4237_s30 }
  0x20   : > { %s3919_s27 = scalar_lea.hbm %s5577_s12, 512 }
  0x21   : > { %p3920_p12 = scmp.ne.s32.totalorder %s5577_s12, %s3919_s27  ;;  %p3921_p13 = pneg %p4232_p11 }
  0x22   : > { %p3926_p5 = scmp.lt.u32.totalorder %s3919_s27, %s5577_s12 }
  0x23   : > { %p3922_p0 = pnand %p3921_p13, %p3920_p12 }
  0x25   : > { %p3923_p3 = pneg %p3922_p0 }
  0x27   : > { %p3928_p7 = pnand %p3926_p5, %p3923_p3 }
  0x29   : > { %3931 = shalt.err (!%p3928_p7)
}
  0x2a   : > { %s3932_s30 = scalar_lea.vmem %s4225_s28, 512  ;;  %p3940_p2 = scmp.lt.s32.totalorder %s4225_s28, %s4225_s28 }
  0x2b   : > { %p3933_p9 = scmp.ne.s32.totalorder %s4225_s28, %s3932_s30  ;;  %p3941_p6 = scmp.lt.s32.totalorder %s3932_s30, %s3932_s30 }
  0x2d   : > { %p3935_p10 = pnand %p3933_p9, %p3921_p13  ;;  %p3942_p4 = por %p3941_p6, %p3940_p2 }
  0x2f   : > { %p3936_p1 = pneg %p3935_p10 }
  0x31   : > { %p3943_p8 = pnand %p3942_p4, %p3936_p1 }
  0x33   : > { %3946 = shalt.err (!%p3943_p8)
}
  0x34   : > { %s4082_s15 = smov 128   ;;  %s4083_s6 = smov 8  }
  0x35   : > { %3775 = dma.hbm_to_vmem [thread:$0]  (!%p4232_p11), %s5577_s12, 512, %s4225_s28, [#allocation6], %s4082_s15, %s4082_s15, %s4083_s6  }
  0x36   : > { %p67_p2 = scmp.eq.s32.totalorder %s66_s17, 0  ;;  %p76_p1 = scmp.ne.s32.totalorder %s4075_s20, %s4071_s19 }
  0x37   : > { %p77_p4 = scmp.eq.s32.totalorder %s4079_s21, 0  ;;  %p3788_p6 = scmp.lt.s32.totalorder %s4079_s21, 2 }
  0x38   : > { %s4268_s25 = scalar_select %p67_p2, %s4075_s20, %s69_s16  }
  0x39   : > { %p78_p8 = por %p77_p4, %p76_p1  ;;  %p5610_p10 = scmp.eq.s32.totalorder %s4202_s22, 1 }
  0x3a   : > { %s464_s23 = sand.u32 1, %s4075_s20   ;;  %s3624_s27 = sshll.u32 %s4079_s21, 10 }
  0x3b   : > { %p4272_p12 = por %p5610_p10, %p76_p1  ;;  %s3506_s7 = sshll.u32 %s464_s23, 6 }
  0x3c   : > { %s5612_s1 = sld [smem:[#allocation18_spill]]  ;;  %s468_s28 = scalar_lea.vmem [#allocation2], %s3506_s7 }
  0x3d   : > { %s475_s16 = sshll.u32 %s468_s28, 4  ;;  %p4283_p11 = pnand %p3788_p6, %p78_p8  ;;  %s4287_s16 = int_to_ptr.vmem [resolvable:$true] %s475_s16 }
  0x3e   : > { %s4289_s15 = scalar_lea.sflag [#allocation3], %s464_s23 }
  0x3f   : > { %p3949_p0 = pneg %p4283_p11 }
  0x42   : > { %s4281_s14 = scalar_lea.hbm %s5612_s1, %s3624_s27  ;;  %s3952_s18 = scalar_lea.hbm %s5612_s1, 2048 }
  0x43   : > { %s3947_s6 = scalar_lea.hbm %s4281_s14, 1024  ;;  %p3953_p7 = scmp.lt.u32.totalorder %s4281_s14, %s5612_s1 }
  0x44   : > { %p3948_p13 = scmp.ne.s32.totalorder %s4281_s14, %s3947_s6  ;;  %p3954_p9 = scmp.lt.u32.totalorder %s3952_s18, %s3947_s6 }
  0x45   : > { %p3956_p1 = scmp.lt.u32.totalorder %s3947_s6, %s4281_s14 }
  0x46   : > { %p3950_p3 = pnand %p3949_p0, %p3948_p13  ;;  %p3955_p2 = por %p3954_p9, %p3953_p7 }
  0x48   : > { %p3951_p5 = pneg %p3950_p3  ;;  %p3957_p4 = por %p3956_p1, %p3955_p2 }
  0x4a   : > { %p3958_p6 = pnand %p3957_p4, %p3951_p5 }
  0x4c   : > { %3961 = shalt.err (!%p3958_p6)
}
  0x4d   : > { %s3962_s23 = scalar_lea.vmem %s4287_s16, 1024  ;;  %s4084_s28 = smov [#allocation2]  }
  0x4e   : > { %p3963_p8 = scmp.ne.s32.totalorder %s4287_s16, %s3962_s23  ;;  %s3967_s7 = sshll.u32 %s4084_s28, 4  ;;  %s3968_s7 = int_to_ptr.vmem [resolvable:$false] %s3967_s7 }
  0x4f   : > { %s3969_s13 = scalar_lea.vmem %s3968_s7, 2048  ;;  %p3970_p3 = scmp.lt.s32.totalorder %s4287_s16, %s3968_s7 }
  0x50   : > { %p3965_p10 = pnand %p3963_p8, %p3949_p0  ;;  %p3971_p7 = scmp.lt.s32.totalorder %s3969_s13, %s3962_s23 }
  0x52   : > { %p3966_p13 = pneg %p3965_p10  ;;  %p3972_p9 = por %p3971_p7, %p3970_p3 }
  0x54   : > { %p3973_p2 = pnand %p3972_p9, %p3966_p13 }
  0x56   : > { %3976 = shalt.err (!%p3973_p2)
}
  0x57   : > { %s4085_s6 = smov 256   ;;  %s4086_s18 = smov 16  }
  0x58   : > { %3779 = dma.hbm_to_vmem [thread:$0]  (!%p4283_p11), %s4281_s14, 1024, %s4287_s16, %s4289_s15, %s4085_s6, %s4085_s6, %s4086_s18  }
  0x59   : > { %p5614_p0 = scmp.ne.s32.totalorder %s5607_s26, 0 }
  0x5a   : > { %s4320_s27 = sand.u32 (!%p5614_p0), 1, %s4071_s19   ;;  %p5615_p5 = scmp.ne.s32.totalorder (!%p5614_p0), %s5604_s24, 0 }
  0x5b   : > { %487 = sbr.rel (%p5614_p0) target bundleno = 1628 (0x65c), region = 76  ;;  %s4323_s29 = sshll.u32 (!%p5614_p0), %s4320_s27, 6 }
  0x5c   : > { %s490_s23 = scalar_lea.sflag (!%p5614_p0), [#allocation3], %s4320_s27  ;;  %s4327_s28 = scalar_lea.vmem (!%p5614_p0), [#allocation2], %s4323_s29 }
  0x62   : > { %4050 = dma.done.wait (%p5615_p5), %s490_s23, 1024  }
  0x63   : > { %4052 = vsyncadd (%p5615_p5), %s490_s23, 4294966272  ;;  %p5616_p11 = scmp.eq.s32.totalorder %s4202_s22, 0 }
  0x65   : > { %4054 = dma.done.wait (%p5616_p11), [#allocation6], 512   ;;  %p5617_p1 = pmov %p5616_p11 }
  0x66   : > { %p554_p4 = scmp.lt.s32.totalorder %s4202_s22, 1  ;;  %v4087_v0 = vmov 0.0   ;;  %v4088_v1 = vmov 0   ;;  %s5618_s0 = sld [smem:[#allocation17_spill]]  ;;  %v4354_v13 = vld [vmem:[%s4327_s28 + $0x8] sm:$0xff]  ;;  %v1110_v15 = vld [vmem:[%s4327_s28 + $0x18] sm:$0xff] }
  0x67   : > { %4056 = vsyncadd (%p5617_p1), [#allocation6], 4294966784  ;;  %672 = vmatprep.mubr.f32.mxu0 %v4087_v0  ;;  %3840 = vset.pattern.permute.xlu0 %v4088_v1  ;;  %v3708_v16 = vpack.c.bf16 %v1110_v15, %v4354_v13  ;;  %v4359_v17 = vld [vmem:[%s4327_s28] sm:$0xff]  ;;  %v4362_v18 = vld [vmem:[%s4327_s28 + $0x10] sm:$0xff]  ;;  %s5619_s2 = sld [smem:[#allocation19_spill]]  ;;  %vm595_vm0 = vcmask 261120  }
  0x68   : > { %s555_s26 = scalar_select %p554_p4, %s4202_s22, 1  ;;  %3841 = vset.pattern.permute.xlu1 %v4088_v1  ;;  %v1112_v19 = vld [vmem:[%s4327_s28 + $0x28] sm:$0xff]  ;;  %v1114_v20 = vld [vmem:[%s4327_s28 + $0x38] sm:$0xff]  ;;  %v3710_v22 = vpack.c.bf16 %v4362_v18, %v4359_v17  ;;  %v1111_v26 = vld [vmem:[%s4327_s28 + $0x20] sm:$0xff] }
  0x69   : > { %s5620_s3 = sld [smem:[#allocation20_spill]]  ;;  %v3712_v25 = vpack.c.bf16 %v1114_v20, %v1112_v19  ;;  %v1113_v27 = vld [vmem:[%s4327_s28 + $0x30] sm:$0xff]  ;;  %v1119_v32 = vld [vmem:[%s5574_s9] sm:$0xff]  ;;  %v1120_v33 = vld [vmem:[%s5574_s9 + $0x8] sm:$0xff]  ;;  %s5621_s4 = sld [smem:[#allocation21_spill]] }
  0x6a   : > { %s3625_s14 = sshll.u32 %s555_s26, 6  ;;  %v3714_v31 = vpack.c.bf16 %v1113_v27, %v1111_v26  ;;  %v1121_v35 = vld [vmem:[%s5574_s9 + $0x10] sm:$0xff]  ;;  %v1122_v36 = vld [vmem:[%s5574_s9 + $0x18] sm:$0xff]  ;;  %v1115_v38 = vld [vmem:[%s5573_s8] sm:$0xff]  ;;  %s5622_s18 = sld [smem:[#allocation24_spill]] }
  0x6b   : > { %v1116_v39 = vld [vmem:[%s5573_s8 + $0x8] sm:$0xff]  ;;  %v1117_v40 = vld [vmem:[%s5573_s8 + $0x10] sm:$0xff]  ;;  %v1118_v41 = vld [vmem:[%s5573_s8 + $0x18] sm:$0xff]  ;;  %s5624_s13 = sld [smem:[#allocation23_spill]]  ;;  %s5625_s15 = sld [smem:[#allocation22_spill]] }
  0x6c   : > { %s4343_s17 = scalar_lea.vmem %s5618_s0, %s3625_s14  ;;  %s4951_s16 = scalar_lea.vmem [#allocation7], %s4323_s29 }
  0x6d   : > { %v560_v2 = vld [vmem:[%s4343_s17 + $0x8] sm:$0xff]  ;;  %v562_v3 = vld [vmem:[%s4343_s17 + $0x18] sm:$0xff]  ;;  %v559_v4 = vld [vmem:[%s4343_s17] sm:$0xff]  ;;  %s4955_s0 = scalar_lea.vmem [#allocation8], %s4323_s29  ;;  %s3626_s29 = sshll.u32 %s4202_s22, 10 }
  0x6e   : > { %v3686_v5 = vpack.c.bf16 %v562_v3, %v560_v2  ;;  %v561_v6 = vld [vmem:[%s4343_s17 + $0x10] sm:$0xff]  ;;  %v564_v7 = vld [vmem:[%s4343_s17 + $0x28] sm:$0xff]  ;;  %v566_v8 = vld [vmem:[%s4343_s17 + $0x38] sm:$0xff]  ;;  %s5638_s7 = sld [smem:[#allocation25_spill]]  ;;  %s5639_s14 = sld [smem:[#allocation26_spill]] }
  0x6f   : > { %v3688_v9 = vpack.c.bf16 %v561_v6, %v559_v4  ;;  %v3690_v10 = vpack.c.bf16 %v566_v8, %v564_v7  ;;  %v563_v11 = vld [vmem:[%s4343_s17 + $0x20] sm:$0xff]  ;;  %v565_v12 = vld [vmem:[%s4343_s17 + $0x30] sm:$0xff]  ;;  %v572_v28 = vld [vmem:[%s5620_s3 + $0x8] sm:$0xff]  ;;  %s3341_s22 = scalar_lea.sflag [#allocation4], %s4320_s27 }
  0x70   : > { %3687 = vmatprep.subr.bf16.mxu0 %v3686_v5  ;;  %v3692_v14 = vpack.c.bf16 %v565_v12, %v563_v11  ;;  %v567_v21 = vld [vmem:[%s5619_s2] sm:$0xff]  ;;  %v573_v24 = vld [vmem:[%s5620_s3 + $0x10] sm:$0xff]  ;;  %v574_v29 = vld [vmem:[%s5620_s3 + $0x18] sm:$0xff]  ;;  %s5623_s23 = smov %s5622_s18 }
  0x71   : > { %3689 = vmatpush1.bf16.msra.mxu0 %v3688_v9  ;;  %v571_v23 = vld [vmem:[%s5620_s3] sm:$0xff]  ;;  %587 = vperm.xlu1 %3841, %v573_v24   ;;  %v568_v30 = vld [vmem:[%s5619_s2 + $0x8] sm:$0xff]  ;;  %v569_v34 = vld [vmem:[%s5619_s2 + $0x10] sm:$0xff] }
  0x72   : > { %3691 = vmatprep.subr.bf16.mxu0 %v3690_v10  ;;  %577 = vperm.xlu0 %3840, %v571_v23   ;;  %v570_v37 = vld [vmem:[%s5619_s2 + $0x18] sm:$0xff]  ;;  %s4097_s2 = smov [#allocation7]  }
  0x73   : > { %s3981_s3 = sshll.u32 %s4097_s2, 4  ;;  %s3982_s3 = int_to_ptr.vmem [resolvable:$false] %s3981_s3 }
  0x74   : > { %s5479_s6 = scalar_lea.hbm %s5638_s7, %s3626_s29  ;;  %s5487_s24 = scalar_lea.hbm %s5639_s14, %s3626_s29 }
  0x75   : > { %3693 = vmatpush1.bf16.msra.mxu0 %v3692_v14  ;;  %592 = vperm.xlu1 %3841, %v574_v29  }
  0x76   : > { %3709 = vmatprep.subr.bf16.mxu0 %v3708_v16  ;;  %582 = vperm.xlu0 %3840, %v572_v28  }
  0x78   : > { %3516 = vmatmul.mubr.msk.f32.vlgmr.msra.gmra.mrb[0].mxu0 %vm595_vm0, %v567_v21 }
  0x79   : > { %678 = vmatprep.mubr.f32.mxu0 %v4087_v0  ;;  %3711 = vmatpush1.bf16.msra.mxu0 %v3710_v22 }
  0x7a   : > { %3713 = vmatprep.subr.bf16.mxu0 %v3712_v25  ;;  %1125 = vperm.xlu0 %3840, %v1119_v32  }
  0x7b   : > { %1130 = vperm.xlu1 %3841, %v1120_v33  }
  0x7c   : > { %3517 = vmatmul.mubr.msk.f32.gmra.mrb[2].mxu0 %vm595_vm0, %v568_v30 }
  0x7d   : > { %684 = vmatprep.mubr.f32.mxu0 %v4087_v0  ;;  %3715 = vmatpush1.bf16.msra.mxu0 %v3714_v31 }
  0x7e   : > { %1135 = vperm.xlu0 %3840, %v1121_v35  }
  0x7f   : > { %1140 = vperm.xlu1 %3841, %v1122_v36  }
  0x80   : > { %3518 = vmatmul.mubr.msk.f32.gmra.mrb[4].mxu0 %vm595_vm0, %v569_v34 }
  0x81   : > { %690 = vmatprep.mubr.f32.mxu0 %v4087_v0 }
  0x84   : > { %3519 = vmatmul.mubr.msk.f32.gmra.mrb[6].mxu0 %vm595_vm0, %v570_v37 }
  0x85   : > { %1219 = vmatprep.mubr.f32.mxu0 %v4087_v0 }
  0x88   : > { %3534 = vmatmul.mubr.msk.f32.vlgmr.msra.gmra.mrb[8].mxu0 %vm595_vm0, %v1115_v38 }
  0x89   : > { %1225 = vmatprep.mubr.f32.mxu0 %v4087_v0 }
  0x8c   : > { %3535 = vmatmul.mubr.msk.f32.gmra.mrb[10].mxu0 %vm595_vm0, %v1116_v39 }
  0x8d   : > { %1231 = vmatprep.mubr.f32.mxu0 %v4087_v0 }
  0x90   : > { %3536 = vmatmul.mubr.msk.f32.gmra.mrb[12].mxu0 %vm595_vm0, %v1117_v40 }
  0x91   : > { %1237 = vmatprep.mubr.f32.mxu0 %v4087_v0 }
  0x94   : > { %3537 = vmatmul.mubr.msk.f32.gmra.mrb[14].mxu0 %vm595_vm0, %v1118_v41 }
  0xf0   : > { %v588_v54 = vpop.permute.xlu1 %587 }
  0xf1   : > { %v578_v42 = vpop.permute.xlu0 %577 }
  0xf4   : > { %v593_v5 = vpop.permute.xlu1 %592 }
  0xf5   : > { %v583_v48 = vpop.permute.xlu0 %582 }
  0xf9   : > { %v1126_v16 = vpop.permute.xlu0 %1125 }
  0xfa   : > { %v1131_v28 = vpop.permute.xlu1 %1130 }
  0xfd   : > { %v1136_v38 = vpop.permute.xlu0 %1135 }
 0x14b   : > { %v674_v43 = vpop.f32.mrb[0].mxu0 }
 0x14c   : > { %v675_v44 = vadd.f32 %v674_v43, %v578_v42  ;;  %v676_v45 = vpop.f32.mrb[1].mxu0 }
 0x14d   : > { %v677_v46 = vadd.f32 %v676_v45, %v578_v42 }
 0x14e   : > { %v705_v47 = vmul.f32 0.1, %v675_v44  ;;  %vm697_vm1 = vcmp.ge.f32.partialorder %v675_v44, 0.0 }
 0x14f   : > { %v706_v49 = vmul.f32 0.1, %v677_v46  ;;  %v680_v50 = vpop.f32.mrb[2].mxu0  ;;  %vm698_vm2 = vcmp.ge.f32.partialorder %v677_v46, 0.0 }
 0x150   : > { %v681_v51 = vadd.f32 %v680_v50, %v583_v48  ;;  %v682_v52 = vpop.f32.mrb[3].mxu0  ;;  %v4433_v53 = vsel %vm697_vm1, %v675_v44, %v705_v47 }
 0x151   : > { %v683_v55 = vadd.f32 %v682_v52, %v583_v48  ;;  %v4435_v56 = vsel %vm698_vm2, %v677_v46, %v706_v49  ;;  %v1141_v48 = vpop.permute.xlu1 %1140  ;;  %vm4090_vm2 = vmmov 0  }
 0x152   : > { %v707_v57 = vmul.f32 0.1, %v681_v51  ;;  %v721_v58 = vadd.f32 %v4435_v56, %v4433_v53  ;;  %vm699_vm3 = vcmp.ge.f32.partialorder %v681_v51, 0.0  ;;  %3656 = vmatprep.mubr.msk.f32.mxu1 %vm4090_vm2, %v4087_v0  ;;  %3675 = vmatprep.mubr.msk.f32.mxu0 %vm4090_vm2, %v4087_v0 }
 0x153   : > { %v708_v59 = vmul.f32 0.1, %v683_v55  ;;  %v686_v60 = vpop.f32.mrb[4].mxu0  ;;  %vm700_vm4 = vcmp.ge.f32.partialorder %v683_v55, 0.0 }
 0x154   : > { %v687_v61 = vadd.f32 %v686_v60, %v588_v54  ;;  %v688_v62 = vpop.f32.mrb[5].mxu0  ;;  %722 = vadd.xlane.f32.xlu0 %v721_v58  ;;  %v4439_v63 = vsel %vm699_vm3, %v681_v51, %v707_v57  ;;  %v4089_v51 = vmov 0.0|0.0   ;;  %vm816_vm3 = vcmask 15360  }
 0x155   : > { %v689_v1 = vadd.f32 %v688_v62, %v588_v54  ;;  %v4441_v2 = vsel %vm700_vm4, %v683_v55, %v708_v59  ;;  %3694 = vmatprep.subr.bf16.mxu1 %v4089_v51  ;;  %3716 = vmatprep.subr.bf16.mxu0 %v4089_v51  ;;  %vm829_vm4 = vcmask 1041408  }
 0x156   : > { %v709_v3 = vmul.f32 0.1, %v687_v61  ;;  %v724_v4 = vadd.f32 %v4441_v2, %v4439_v63  ;;  %vm701_vm5 = vcmp.ge.f32.partialorder %v687_v61, 0.0 }
 0x157   : > { %v710_v6 = vmul.f32 0.1, %v689_v1  ;;  %v692_v7 = vpop.f32.mrb[6].mxu0  ;;  %vm702_vm6 = vcmp.ge.f32.partialorder %v689_v1, 0.0 }
 0x158   : > { %v693_v8 = vadd.f32 %v692_v7, %v593_v5  ;;  %v694_v9 = vpop.f32.mrb[7].mxu0  ;;  %725 = vadd.xlane.f32.xlu1 %v724_v4  ;;  %v4445_v10 = vsel %vm701_vm5, %v687_v61, %v709_v3 }
 0x159   : > { %v695_v11 = vadd.f32 %v694_v9, %v593_v5  ;;  %v4447_v12 = vsel %vm702_vm6, %v689_v1, %v710_v6 }
 0x15a   : > { %v711_v14 = vmul.f32 0.1, %v693_v8  ;;  %v727_v15 = vadd.f32 %v4447_v12, %v4445_v10  ;;  %vm703_vm7 = vcmp.ge.f32.partialorder %v693_v8, 0.0 }
 0x15b   : > { %v712_v19 = vmul.f32 0.1, %v695_v11  ;;  %v1221_v20 = vpop.f32.mrb[8].mxu0  ;;  %vm704_vm8 = vcmp.ge.f32.partialorder %v695_v11, 0.0 }
 0x15c   : > { %v1222_v21 = vadd.f32 %v1221_v20, %v1126_v16  ;;  %v1223_v22 = vpop.f32.mrb[9].mxu0  ;;  %728 = vadd.xlane.f32.xlu0 %v727_v15  ;;  %v4451_v23 = vsel %vm703_vm7, %v693_v8, %v711_v14 }
 0x15d   : > { %v1224_v24 = vadd.f32 %v1223_v22, %v1126_v16  ;;  %v4453_v25 = vsel %vm704_vm8, %v695_v11, %v712_v19  ;;  %v737_v19 = vld [vmem:[%s5621_s4] sm:$0x3]  ;;  %s3983_s4 = scalar_lea.vmem %s3982_s3, 2048 }
 0x15e   : > { %v1252_v26 = vmul.f32 0.1, %v1222_v21  ;;  %v730_v27 = vadd.f32 %v4453_v25, %v4451_v23  ;;  %vm1244_vm9 = vcmp.ge.f32.partialorder %v1222_v21, 0.0 }
 0x15f   : > { %v1253_v29 = vmul.f32 0.1, %v1224_v24  ;;  %v1227_v30 = vpop.f32.mrb[10].mxu0  ;;  %vm1245_vm10 = vcmp.ge.f32.partialorder %v1224_v24, 0.0 }
 0x160   : > { %v1228_v31 = vadd.f32 %v1227_v30, %v1131_v28  ;;  %v1229_v32 = vpop.f32.mrb[11].mxu0  ;;  %731 = vadd.xlane.f32.xlu0 %v730_v27  ;;  %v4457_v33 = vsel %vm1244_vm9, %v1222_v21, %v1252_v26 }
 0x161   : > { %v1230_v34 = vadd.f32 %v1229_v32, %v1131_v28  ;;  %v4459_v35 = vsel %vm1245_vm10, %v1224_v24, %v1253_v29  ;;  %v1284_v32 = vld [vmem:[%s5575_s10] sm:$0x3] }
 0x162   : > { %v1254_v36 = vmul.f32 0.1, %v1228_v31  ;;  %v1268_v37 = vadd.f32 %v4459_v35, %v4457_v33  ;;  %vm1246_vm11 = vcmp.ge.f32.partialorder %v1228_v31, 0.0 }
 0x163   : > { %v1255_v39 = vmul.f32 0.1, %v1230_v34  ;;  %v1233_v40 = vpop.f32.mrb[12].mxu0  ;;  %vm1247_vm12 = vcmp.ge.f32.partialorder %v1230_v34, 0.0 }
 0x164   : > { %v1234_v41 = vadd.f32 %v1233_v40, %v1136_v38  ;;  %v1235_v42 = vpop.f32.mrb[13].mxu0  ;;  %1269 = vadd.xlane.f32.xlu1 %v1268_v37  ;;  %v4463_v43 = vsel %vm1246_vm11, %v1228_v31, %v1254_v36  ;;  %v1359_v36 = vld [vmem:[%s5576_s11] sm:$0xff]  ;;  %v813_v40 = vld [vmem:[%s5570_s5 + $0x8] sm:$0xff] }
 0x165   : > { %v1236_v44 = vadd.f32 %v1235_v42, %v1136_v38  ;;  %v4465_v45 = vsel %vm1247_vm12, %v1230_v34, %v1255_v39  ;;  %v812_v34 = vld [vmem:[%s5570_s5] sm:$0xff]  ;;  %v815_v42 = vld [vmem:[%s5570_s5 + $0x18] sm:$0xff] }
 0x166   : > { %v1256_v46 = vmul.f32 0.1, %v1234_v41  ;;  %v1271_v47 = vadd.f32 %v4465_v45, %v4463_v43  ;;  %vm1248_vm13 = vcmp.ge.f32.partialorder %v1234_v41, 0.0 }
 0x167   : > { %v1257_v49 = vmul.f32 0.1, %v1236_v44  ;;  %v1239_v50 = vpop.f32.mrb[14].mxu0  ;;  %vm1249_vm14 = vcmp.ge.f32.partialorder %v1236_v44, 0.0 }
 0x168   : > { %v1240_v52 = vadd.f32 %v1239_v50, %v1141_v48  ;;  %v1241_v54 = vpop.f32.mrb[15].mxu0  ;;  %1272 = vadd.xlane.f32.xlu0 %v1271_v47  ;;  %v4469_v55 = vsel %vm1248_vm13, %v1234_v41, %v1256_v46  ;;  %v814_v41 = vld [vmem:[%s5570_s5 + $0x10] sm:$0xff]  ;;  %v1362_v50 = vld [vmem:[%s5576_s11 + $0x18] sm:$0xff] }
 0x169   : > { %v1242_v57 = vadd.f32 %v1241_v54, %v1141_v48  ;;  %v4471_v58 = vsel %vm1249_vm14, %v1236_v44, %v1257_v49  ;;  %v1360_v48 = vld [vmem:[%s5576_s11 + $0x8] sm:$0xff]  ;;  %v1361_v49 = vld [vmem:[%s5576_s11 + $0x10] sm:$0xff] }
 0x16a   : > { %v1258_v59 = vmul.f32 0.1, %v1240_v52  ;;  %v1274_v60 = vadd.f32 %v4471_v58, %v4469_v55  ;;  %vm1250_vm15 = vcmp.ge.f32.partialorder %v1240_v52, 0.0 }
 0x16b   : > { %v1259_v61 = vmul.f32 0.1, %v1242_v57  ;;  %vm1251_vm1 = vcmp.ge.f32.partialorder %v1242_v57, 0.0 }
 0x16c   : > { %1275 = vadd.xlane.f32.xlu1 %v1274_v60  ;;  %v4475_v62 = vsel %vm1250_vm15, %v1240_v52, %v1258_v59 }
 0x16d   : > { %v4477_v1 = vsel %vm1251_vm1, %v1242_v57, %v1259_v61 }
 0x16e   : > { %v1277_v3 = vadd.f32 %v4477_v1, %v4475_v62 }
 0x170   : > { %1278 = vadd.xlane.f32.xlu0 %v1277_v3 }
 0x1e1   : > { %v723_v4 = vpop.xlane.xlu0 %722 }
 0x1e2   : > { %v733_v6 = vmul.f32 0.00390625, %v723_v4 }
 0x1e5   : > { %v726_v5 = vpop.xlane.xlu1 %725 }
 0x1e6   : > { %v734_v7 = vmul.f32 0.00390625, %v726_v5 }
 0x1e8   : > { %v3695_v8 = vpack.c.bf16 %v734_v7, %v733_v6 }
 0x1e9   : > { %v729_v9 = vpop.xlane.xlu0 %728 }
 0x1ea   : > { %3696 = vmatpush3.bf16.msra.mxu1 %v3695_v8  ;;  %v735_v14 = vmul.f32 0.00390625, %v729_v9 }
 0x1eb   : > { %3697 = vmatprep.subr.bf16.mxu1 %v4089_v51 }
 0x1ed   : > { %v732_v11 = vpop.xlane.xlu0 %731 }
 0x1ee   : > { %v736_v15 = vmul.f32 0.00390625, %v732_v11 }
 0x1f0   : > { %v3698_v16 = vpack.c.bf16 %v736_v15, %v735_v14 }
 0x1f1   : > { %v1270_v20 = vpop.xlane.xlu1 %1269 }
 0x1f2   : > { %3699 = vmatpush3.bf16.msra.mxu1 %v3698_v16  ;;  %v1280_v22 = vmul.f32 0.00390625, %v1270_v20 }
 0x1f5   : > { %3657 = vmatmul.mubr.msk.f32.vlgmr.msra.gmra.mrb[0].mxu1 %vm595_vm0, %v737_v19  ;;  %v1273_v21 = vpop.xlane.xlu0 %1272 }
 0x1f6   : > { %v1281_v24 = vmul.f32 0.00390625, %v1273_v21  ;;  %3661 = vmatprep.mubr.msk.f32.mxu1 %vm816_vm3, %v812_v34 }
 0x1f8   : > { %v3717_v26 = vpack.c.bf16 %v1281_v24, %v1280_v22 }
 0x1f9   : > { %v1276_v27 = vpop.xlane.xlu1 %1275 }
 0x1fa   : > { %3718 = vmatpush3.bf16.msra.mxu0 %v3717_v26  ;;  %v1282_v29 = vmul.f32 0.00390625, %v1276_v27 }
 0x1fb   : > { %3719 = vmatprep.subr.bf16.mxu0 %v4089_v51 }
 0x1fd   : > { %v1279_v28 = vpop.xlane.xlu0 %1278 }
 0x1fe   : > { %v1283_v30 = vmul.f32 0.00390625, %v1279_v28 }
 0x200   : > { %v3720_v31 = vpack.c.bf16 %v1283_v30, %v1282_v29 }
 0x202   : > { %3721 = vmatpush3.bf16.msra.mxu0 %v3720_v31 }
 0x205   : > { %3676 = vmatmul.mubr.msk.f32.vlgmr.msra.gmra.mrb[16].mxu0 %vm595_vm0, %v1284_v32 }
 0x206   : > { %3680 = vmatprep.mubr.msk.f32.mxu0 %vm816_vm3, %v1359_v36 }
 0x2c8   : > { %v807_v37 = vpop.f32.mrb[0].mxu1 }
 0x2c9   : > { %v811_v38 = vmax.f32 %v807_v37, 0.0  ;;  %v3658_v39 = vpop.f32.mrb[1].mxu1 }
 0x2cb   : > { %3659 = vmatprep.subr.msk.mxu1 %vm829_vm4, %v811_v38 }
 0x2cc   : > { %3660 = vmatpush3.msk.msra.mxu1 %vm829_vm4, %v811_v38 }
 0x2cd   : > { %3662 = vmatmul.mubr.msk.f32.vlgmr.msra.gmra.mrb[2].mxu1 %vm816_vm3, %v813_v40 }
 0x2ce   : > { %3664 = vmatprep.mubr.msk.f32.mxu1 %vm816_vm3, %v814_v41 }
 0x2d1   : > { %3665 = vmatmul.mubr.msk.f32.gmra.mrb[4].mxu1 %vm816_vm3, %v815_v42 }
 0x2d2   : > { %1074 = vmatprep.mubr.f32.mxu1 %v4087_v0 }
 0x2d8   : > { %v1354_v44 = vpop.f32.mrb[16].mxu0 }
 0x2d9   : > { %v1358_v46 = vmax.f32 %v1354_v44, 0.0  ;;  %v3677_v47 = vpop.f32.mrb[17].mxu0 }
 0x2da   : > { %v1520_v47 = vld [vmem:[%s5622_s18 + $0x8] sm:$0xff]  ;;  %s3375_s18 = sshll.u32 %s4955_s0, 4  ;;  %s5489_s18 = int_to_ptr.vmem [resolvable:$true] %s3375_s18 }
 0x2db   : > { %3678 = vmatprep.subr.msk.mxu0 %vm829_vm4, %v1358_v46 }
 0x2dc   : > { %3679 = vmatpush3.msk.msra.mxu0 %vm829_vm4, %v1358_v46 }
 0x2dd   : > { %3681 = vmatmul.mubr.msk.f32.vlgmr.msra.gmra.mrb[18].mxu0 %vm816_vm3, %v1360_v48  ;;  %v1519_v48 = vld [vmem:[%s5623_s23] sm:$0xff] }
 0x2de   : > { %3683 = vmatprep.mubr.msk.f32.mxu0 %vm816_vm3, %v1361_v49  ;;  %v1522_v49 = vld [vmem:[%s5623_s23 + $0x18] sm:$0xff] }
 0x2e1   : > { %3684 = vmatmul.mubr.msk.f32.gmra.mrb[20].mxu0 %vm816_vm3, %v1362_v50  ;;  %v1521_v50 = vld [vmem:[%s5623_s23 + $0x10] sm:$0xff] }
 0x3a0   : > { %v3663_v51 = vpop.f32.mrb[2].mxu1 }
 0x3a1   : > { %v3527_v52 = vmul.f32 -1.442695, %v3663_v51  ;;  %v899_v54 = vpop.f32.mrb[3].mxu1  ;;  %v975_v51 = vld [vmem:[%s5624_s13 + $0x8] sm:$0xff] }
 0x3a2   : > { %v3526_v57 = vmul.f32 -1.442695, %v899_v54  ;;  %v977_v54 = vld [vmem:[%s5624_s13 + $0x18] sm:$0xff] }
 0x3a3   : > { %3842 = vpow2.f32 %v3527_v52  ;;  %v974_v52 = vld [vmem:[%s5624_s13] sm:$0xff] }
 0x3a4   : > { %3844 = vpow2.f32 %v3526_v57  ;;  %v3666_v59 = vpop.f32.mrb[4].mxu1  ;;  %v976_v57 = vld [vmem:[%s5624_s13 + $0x10] sm:$0xff] }
 0x3a5   : > { %v3529_v60 = vmul.f32 -1.442695, %v3666_v59  ;;  %v909_v61 = vpop.f32.mrb[5].mxu1 }
 0x3a6   : > { %v3528_v3 = vmul.f32 -1.442695, %v909_v61 }
 0x3a7   : > { %3846 = vpow2.f32 %v3529_v60 }
 0x3a8   : > { %3848 = vpow2.f32 %v3528_v3 }
 0x3ad   : > { %v3843_v4 = vpop.eup %3842 }
 0x3ae   : > { %v3845_v5 = vpop.eup %3844  ;;  %v931_v6 = vadd.f32 1.0, %v3843_v4 }
 0x3af   : > { %v930_v7 = vadd.f32 1.0, %v3845_v5 }
 0x3b0   : > { %3850 = vrcp.f32 %v931_v6  ;;  %v3682_v8 = vpop.f32.mrb[18].mxu0 }
 0x3b1   : > { %v3847_v9 = vpop.eup %3846  ;;  %3852 = vrcp.f32 %v930_v7  ;;  %v3545_v11 = vmul.f32 -1.442695, %v3682_v8  ;;  %v1444_v14 = vpop.f32.mrb[19].mxu0 }
 0x3b2   : > { %v3849_v15 = vpop.eup %3848  ;;  %v3544_v16 = vmul.f32 -1.442695, %v1444_v14  ;;  %v933_v21 = vadd.f32 1.0, %v3847_v9 }
 0x3b3   : > { %v932_v19 = vadd.f32 1.0, %v3849_v15  ;;  %3854 = vpow2.f32 %v3545_v11 }
 0x3b4   : > { %v3685_v20 = vpop.f32.mrb[20].mxu0 }
 0x3b5   : > { %3856 = vrcp.f32 %v932_v19  ;;  %v3547_v22 = vmul.f32 -1.442695, %v3685_v20  ;;  %v1454_v24 = vpop.f32.mrb[21].mxu0 }
 0x3b6   : > { %3858 = vpow2.f32 %v3544_v16  ;;  %v3546_v26 = vmul.f32 -1.442695, %v1454_v24 }
 0x3b7   : > { %3860 = vpow2.f32 %v3547_v22 }
 0x3b8   : > { %3862 = vpow2.f32 %v3546_v26 }
 0x3b9   : > { %3864 = vrcp.f32 %v933_v21 }
 0x3ba   : > { %v3851_v27 = vpop.eup %3850 }
 0x3bb   : > { %v3853_v28 = vpop.eup %3852  ;;  %953 = vperm.xlu0 %3840, %v3851_v27   ;;  %v944_v27 = vld [vmem:[%s5625_s15 + $0x10] sm:$0xff] }
 0x3bc   : > { %948 = vperm.xlu1 %3841, %v3853_v28  }
 0x3bd   : > { %v3855_v29 = vpop.eup %3854 }
 0x3be   : > { %v1476_v30 = vadd.f32 1.0, %v3855_v29 }
 0x3bf   : > { %v3857_v31 = vpop.eup %3856 }
 0x3c0   : > { %v3859_v32 = vpop.eup %3858  ;;  %3866 = vrcp.f32 %v1476_v30  ;;  %958 = vperm.xlu1 %3841, %v3857_v31   ;;  %v1490_v30 = vld [vmem:[#allocation5 + $0x18] sm:$0xff] }
 0x3c1   : > { %v3861_v34 = vpop.eup %3860  ;;  %v1475_v36 = vadd.f32 1.0, %v3859_v32 }
 0x3c2   : > { %v3863_v37 = vpop.eup %3862  ;;  %v1478_v38 = vadd.f32 1.0, %v3861_v34 }
 0x3c3   : > { %v3865_v39 = vpop.eup %3864  ;;  %3868 = vrcp.f32 %v1475_v36  ;;  %v1477_v40 = vadd.f32 1.0, %v3863_v37 }
 0x3c4   : > { %3870 = vrcp.f32 %v1478_v38  ;;  %963 = vperm.xlu1 %3841, %v3865_v39  }
 0x3c5   : > { %3872 = vrcp.f32 %v1477_v40 }
 0x3ca   : > { %v3867_v41 = vpop.eup %3866 }
 0x3cb   : > { %1498 = vperm.xlu1 %3841, %v3867_v41  }
 0x3cd   : > { %v3869_v42 = vpop.eup %3868 }
 0x3ce   : > { %v3871_v44 = vpop.eup %3870  ;;  %1493 = vperm.xlu0 %3840, %v3869_v42  }
 0x3cf   : > { %v3873_v46 = vpop.eup %3872  ;;  %1508 = vperm.xlu1 %3841, %v3871_v44  }
 0x3d2   : > { %1503 = vperm.xlu0 %3840, %v3873_v46  }
 0x3d3   : > { %1530 = vperm.xlu1 %3841, %v1520_v47  }
 0x3d6   : > { %1525 = vperm.xlu0 %3840, %v1519_v48  }
 0x3d7   : > { %1540 = vperm.xlu1 %3841, %v1522_v49  }
 0x3da   : > { %1535 = vperm.xlu0 %3840, %v1521_v50  }
 0x3db   : > { %985 = vperm.xlu1 %3841, %v975_v51  }
 0x3de   : > { %980 = vperm.xlu0 %3840, %v974_v52  }
 0x3df   : > { %995 = vperm.xlu1 %3841, %v977_v54  }
 0x3e2   : > { %990 = vperm.xlu0 %3840, %v976_v57  }
 0x43a   : > { %v954_v59 = vpop.permute.xlu0 %953 }
 0x43b   : > { %v968_v60 = vmul.f32 %v954_v59, %v4439_v63  ;;  %v969_v61 = vmul.f32 %v954_v59, %v4441_v2  ;;  %v949_v3 = vpop.permute.xlu1 %948 }
 0x43c   : > { %v966_v4 = vmul.f32 %v949_v3, %v4433_v53  ;;  %v967_v5 = vmul.f32 %v949_v3, %v4435_v56  ;;  %v942_v53 = vld [vmem:[%s5625_s15] sm:$0xff] }
 0x43e   : > { %v3700_v6 = vpack.c.bf16 %v969_v61, %v967_v5  ;;  %v3702_v7 = vpack.c.bf16 %v968_v60, %v966_v4 }
 0x43f   : > { %v959_v8 = vpop.permute.xlu1 %958 }
 0x440   : > { %3701 = vmatprep.subr.bf16.mxu1 %v3700_v6  ;;  %v970_v11 = vmul.f32 %v959_v8, %v4445_v10  ;;  %v971_v14 = vmul.f32 %v959_v8, %v4447_v12  ;;  %v943_v12 = vld [vmem:[%s5625_s15 + $0x8] sm:$0xff] }
 0x441   : > { %3703 = vmatpush1.bf16.msra.mxu1 %v3702_v7 }
 0x443   : > { %v964_v9 = vpop.permute.xlu1 %963 }
 0x444   : > { %v972_v15 = vmul.f32 %v964_v9, %v4451_v23  ;;  %v973_v63 = vmul.f32 %v964_v9, %v4453_v25 }
 0x446   : > { %v3704_v2 = vpack.c.bf16 %v973_v63, %v971_v14  ;;  %v3706_v16 = vpack.c.bf16 %v972_v15, %v970_v11 }
 0x448   : > { %3705 = vmatprep.subr.bf16.mxu1 %v3704_v2 }
 0x449   : > { %3707 = vmatpush1.bf16.msra.mxu1 %v3706_v16 }
 0x44a   : > { %v1499_v56 = vpop.permute.xlu1 %1498 }
 0x44b   : > { %v1513_v19 = vmul.f32 %v1499_v56, %v4463_v43  ;;  %v1514_v20 = vmul.f32 %v1499_v56, %v4465_v45 }
 0x44c   : > { %3530 = vmatmul.mubr.msk.f32.vlgmr.msra.gmra.mrb[6].mxu1 %vm595_vm0, %v942_v53 }
 0x44d   : > { %v1494_v10 = vpop.permute.xlu0 %1493  ;;  %1080 = vmatprep.mubr.f32.mxu1 %v4087_v0 }
 0x44e   : > { %v1511_v23 = vmul.f32 %v1494_v10, %v4457_v33  ;;  %v1512_v25 = vmul.f32 %v1494_v10, %v4459_v35  ;;  %v1509_v21 = vpop.permute.xlu1 %1508 }
 0x44f   : > { %v1517_v43 = vmul.f32 %v1509_v21, %v4475_v62  ;;  %v1518_v45 = vmul.f32 %v1509_v21, %v4477_v1  ;;  %v945_v62 = vld [vmem:[%s5625_s15 + $0x18] sm:$0xff]  ;;  %v1489_v1 = vld [vmem:[#allocation5 + $0x10] sm:$0xff]  ;;  %v4091_v21 = vmov 683565275  }
 0x450   : > { %v3722_v22 = vpack.c.bf16 %v1514_v20, %v1512_v25  ;;  %v3724_v24 = vpack.c.bf16 %v1513_v19, %v1511_v23  ;;  %3531 = vmatmul.mubr.msk.f32.gmra.mrb[8].mxu1 %vm595_vm0, %v943_v12 }
 0x451   : > { %v1504_v26 = vpop.permute.xlu0 %1503  ;;  %1086 = vmatprep.mubr.f32.mxu1 %v4087_v0 }
 0x452   : > { %v1515_v33 = vmul.f32 %v1504_v26, %v4469_v55  ;;  %v1516_v35 = vmul.f32 %v1504_v26, %v4471_v58  ;;  %3723 = vmatprep.subr.bf16.mxu1 %v3722_v22  ;;  %v1487_v55 = vld [vmem:[#allocation5] sm:$0xff]  ;;  %v1488_v58 = vld [vmem:[#allocation5 + $0x8] sm:$0xff]  ;;  %v4621_v54 = vpop.permute.xlu1 %1530 }
 0x453   : > { %3725 = vmatpush1.bf16.msra.mxu1 %v3724_v24 }
 0x454   : > { %v3726_v28 = vpack.c.bf16 %v1518_v45, %v1516_v35  ;;  %v3728_v29 = vpack.c.bf16 %v1517_v43, %v1515_v33  ;;  %3532 = vmatmul.mubr.msk.f32.gmra.mrb[10].mxu1 %vm595_vm0, %v944_v27  ;;  %v4092_v45 = vmov 2475754826   ;;  %v4093_v27 = vmov 2131351028  }
 0x455   : > { %1092 = vmatprep.mubr.f32.mxu1 %v4087_v0  ;;  %v4094_v35 = vmov 2102212464  }
 0x456   : > { %3727 = vmatprep.subr.bf16.mxu1 %v3726_v28 }
 0x457   : > { %3729 = vmatpush1.bf16.msra.mxu1 %v3728_v29  ;;  %v4095_v29 = vmov 920167782  }
 0x458   : > { %3533 = vmatmul.mubr.msk.f32.gmra.mrb[12].mxu1 %vm595_vm0, %v945_v62 }
 0x459   : > { %1619 = vmatprep.mubr.f32.mxu1 %v4087_v0 }
 0x45c   : > { %3548 = vmatmul.mubr.msk.f32.vlgmr.msra.gmra.mrb[14].mxu1 %vm595_vm0, %v1487_v55 }
 0x45d   : > { %1625 = vmatprep.mubr.f32.mxu1 %v4087_v0 }
 0x460   : > { %3549 = vmatmul.mubr.msk.f32.gmra.mrb[16].mxu1 %vm595_vm0, %v1488_v58 }
 0x461   : > { %1631 = vmatprep.mubr.f32.mxu1 %v4087_v0 }
 0x464   : > { %3550 = vmatmul.mubr.msk.f32.gmra.mrb[18].mxu1 %vm595_vm0, %v1489_v1 }
 0x465   : > { %1637 = vmatprep.mubr.f32.mxu1 %v4087_v0  ;;  %v1526_v0 = vpop.permute.xlu0 %1525 }
 0x468   : > { %3551 = vmatmul.mubr.msk.f32.gmra.mrb[20].mxu1 %vm595_vm0, %v1490_v30 }
 0x51f   : > { %v4595_v31 = vpop.f32.mrb[6].mxu1 }
 0x520   : > { %v4597_v32 = vpop.f32.mrb[7].mxu1 }
 0x523   : > { %v4599_v34 = vpop.f32.mrb[8].mxu1 }
 0x524   : > { %v4601_v36 = vpop.f32.mrb[9].mxu1 }
 0x527   : > { %v4603_v37 = vpop.f32.mrb[10].mxu1 }
 0x528   : > { %v4605_v38 = vpop.f32.mrb[11].mxu1 }
 0x52b   : > { %v4607_v39 = vpop.f32.mrb[12].mxu1 }
 0x52c   : > { %v4609_v40 = vpop.f32.mrb[13].mxu1 }
 0x52f   : > { %v1621_v41 = vpop.f32.mrb[14].mxu1 }
 0x530   : > { %v1622_v42 = vadd.f32 %v1621_v41, %v1526_v0  ;;  %v1623_v44 = vpop.f32.mrb[15].mxu1  ;;  %v4096_v41 = vmov 1326507024  }
 0x531   : > { %v1624_v46 = vadd.f32 %v1623_v44, %v1526_v0 }
 0x532   : > { %v4612_v47 = vadd.f32 %v1622_v42, %v4359_v17 }
 0x533   : > { %v4615_v48 = vadd.f32 %v1624_v46, %v4354_v13  ;;  %v1627_v49 = vpop.f32.mrb[16].mxu1 }
 0x534   : > { %v1652_v50 = vand.u32 2147483647, %v4612_v47  ;;  %v1655_v51 = vand.u32 2139095040, %v4612_v47  ;;  %v4619_v52 = vpop.f32.mrb[17].mxu1  ;;  %v1628_v17 = vadd.f32 %v1627_v49, %v4621_v54  ;;  %vm1654_vm2 = vcmp.lt.s32.totalorder %v4612_v47, 0 }
 0x535   : > { %v1755_v57 = vand.u32 2147483647, %v4615_v48  ;;  %v1758_v59 = vand.u32 2139095040, %v4615_v48 }
 0x536   : > { %v1656_v60 = vshrl.u32 %v1655_v51, 23  ;;  %v1659_v13 = vand.u32 8388607, %v1652_v50  ;;  %v4633_v6 = vadd.f32 %v1628_v17, %v4362_v18  ;;  %vm4736_vm3 = vcmp.le.f32.partialorder %v1652_v50, 0.7853982 }
 0x537   : > { %v1759_v61 = vshrl.u32 %v1758_v59, 23  ;;  %v1762_v3 = vand.u32 8388607, %v1755_v57  ;;  %v4630_v4 = vpop.f32.mrb[18].mxu1 }
 0x538   : > { %v3552_v5 = vadd.s32 4294967169, %v1656_v60  ;;  %v4635_v7 = vpop.f32.mrb[19].mxu1  ;;  %v1660_v11 = vor.u32 8388608, %v1659_v13  ;;  %v1861_v63 = vand.u32 2139095040, %v4633_v6  ;;  %v1858_v23 = vand.u32 2147483647, %v4633_v6 }
 0x539   : > { %v3556_v8 = vadd.s32 4294967169, %v1759_v61  ;;  %v1763_v14 = vor.u32 8388608, %v1762_v3 }
 0x53a   : > { %v1662_v9 = vadd.s32 1, %v3552_v5  ;;  %v1862_v53 = vshrl.u32 %v1861_v63, 23  ;;  %v4640_v18 = vshll.u32 %v1660_v11, 8 }
 0x53b   : > { %v1765_v15 = vadd.s32 1, %v3556_v8  ;;  %v4638_v2 = vpop.f32.mrb[20].mxu1  ;;  %v4644_v12 = vshll.u32 %v1763_v14, 8 }
 0x53c   : > { %vm1663_vm0 = vcmp.gt.s32.totalorder %v1662_v9, 0  ;;  %v4648_v43 = vadd.s32 4294967169, %v1862_v53 }
 0x53d   : > { %v1664_v16 = vsel %vm1663_vm0, %v1662_v9, 0  ;;  %vm1766_vm5 = vcmp.gt.s32.totalorder %v1765_v15, 0  ;;  %vm1757_vm0 = vcmp.lt.s32.totalorder %v4615_v48, 0 }
 0x53e   : > { %v1665_v56 = vshrl.u32 %v1664_v16, 5  ;;  %v1666_v19 = vand.u32 31, %v1664_v16  ;;  %v1767_v20 = vsel %vm1766_vm5, %v1765_v15, 0 }
 0x53f   : > { %v4642_v10 = vshrl.u32 %v1767_v20, 5  ;;  %v1769_v24 = vand.u32 31, %v1767_v20 }
 0x540   : > { %v1667_v25 = vsub.s32 32, %v1666_v19  ;;  %v1669_v22 = vshll.u32 %v4091_v21, %v1666_v19  ;;  %v1672_v26 = vshll.u32 %v4092_v45, %v1666_v19  ;;  %v1675_v33 = vshll.u32 %v4093_v27, %v1666_v19 }
 0x541   : > { %v1678_v28 = vshll.u32 %v4094_v35, %v1666_v19  ;;  %v1681_v62 = vshll.u32 %v4095_v29, %v1666_v19  ;;  %vm1684_vm6 = vcmp.lt.s32.totalorder %v1665_v56, 1  ;;  %vm1685_vm7 = vcmp.lt.s32.totalorder %v1665_v56, 2 }
 0x542   : > { %v1670_v55 = vshrl.u32 %v4092_v45, %v1667_v25  ;;  %v1673_v58 = vshrl.u32 %v4093_v27, %v1667_v25  ;;  %v1676_v1 = vshrl.u32 %v4094_v35, %v1667_v25  ;;  %v1668_v30 = vshrl.u32 %v4091_v21, %v1667_v25 }
 0x543   : > { %v1679_v0 = vshrl.u32 %v4095_v29, %v1667_v25  ;;  %v1682_v42 = vshrl.u32 %v4096_v41, %v1667_v25  ;;  %v1770_v51 = vsub.s32 32, %v1769_v24  ;;  %vm1686_vm8 = vcmp.lt.s32.totalorder %v1665_v56, 3 }
 0x544   : > { %v1671_v44 = vor.u32 %v1670_v55, %v1669_v22  ;;  %v1674_v46 = vor.u32 %v1673_v58, %v1672_v26  ;;  %v1677_v49 = vor.u32 %v1676_v1, %v1675_v33  ;;  %vm1687_vm9 = vcmp.lt.s32.totalorder %v1665_v56, 4 }
 0x545   : > { %v1680_v59 = vor.u32 %v1679_v0, %v1678_v28  ;;  %v1683_v60 = vor.u32 %v1682_v42, %v1681_v62  ;;  %v1772_v11 = vshll.u32 %v4091_v21, %v1769_v24  ;;  %v1773_v63 = vshrl.u32 %v4092_v45, %v1770_v51 }
 0x546   : > { %v1688_v17 = vsel %vm1684_vm6, %v1668_v30, %v1671_v44  ;;  %v1689_v13 = vsel %vm1687_vm9, %v1677_v49, 2102212464  ;;  %v1692_v61 = vsel %vm1684_vm6, %v1671_v44, %v1674_v46  ;;  %v1696_v3 = vsel %vm1684_vm6, %v1674_v46, %v1677_v49  ;;  %v4681_v30 = vpop.f32.mrb[21].mxu1 }
 0x547   : > { %v1690_v5 = vsel %vm1686_vm8, %v1674_v46, %v1689_v13  ;;  %v1693_v8 = vsel %vm1687_vm9, %v1680_v59, 920167782  ;;  %v1697_v9 = vsel %vm1687_vm9, %v1683_v60, 1326507024  ;;  %v1775_v16 = vshll.u32 %v4092_v45, %v1769_v24 }
 0x548   : > { %v1694_v14 = vsel %vm1686_vm8, %v1677_v49, %v1693_v8  ;;  %v1698_v15 = vsel %vm1686_vm8, %v1680_v59, %v1697_v9  ;;  %v1691_v53 = vsel %vm1685_vm7, %v1688_v17, %v1690_v5  ;;  %v1776_v25 = vshrl.u32 %v4093_v27, %v1770_v51 }
 0x549   : > { %v1695_v19 = vsel %vm1685_vm7, %v1692_v61, %v1694_v14  ;;  %v1699_v20 = vsel %vm1685_vm7, %v1696_v3, %v1698_v15  ;;  %v1774_v62 = vor.u32 %v1773_v63, %v1772_v11  ;;  %v1778_v58 = vshll.u32 %v4093_v27, %v1769_v24  ;;  %v4697_v14 = vpop.permute.xlu0 %1535 }
 0x54a   : > { %v4671_v22 = vmul.u32.u64.low %v4640_v18, %v1699_v20  ;;  %v4672_v26 = vmul.u32.u64.high %v4640_v18, %v1699_v20, %v4671_v22  ;;  %v4675_v33 = vmul.u32.u64.low %v4640_v18, %v1695_v19  ;;  %v4676_v28 = vmul.u32.u64.high %v4640_v18, %v1695_v19, %v4675_v33 }
 0x54b   : > { %v1777_v55 = vor.u32 %v1776_v25, %v1775_v16  ;;  %v1779_v1 = vshrl.u32 %v4094_v35, %v1770_v51  ;;  %v1771_v56 = vshrl.u32 %v4091_v21, %v1770_v51  ;;  %v1781_v0 = vshll.u32 %v4094_v35, %v1769_v24 }
 0x54c   : > { %v1782_v42 = vshrl.u32 %v4095_v29, %v1770_v51  ;;  %v1785_v44 = vshrl.u32 %v4096_v41, %v1770_v51  ;;  %v1707_v46 = vmul.u32 %v4640_v18, %v1691_v53  ;;  %v1784_v59 = vshll.u32 %v4095_v29, %v1769_v24 }
 0x54d   : > { %v1780_v49 = vor.u32 %v1779_v1, %v1778_v58  ;;  %vm1787_vm10 = vcmp.lt.s32.totalorder %v4642_v10, 1  ;;  %vm1709_vm11 = vc.u32 %v4672_v26, %v4675_v33  ;;  %v1710_v60 = vadd.s32 1, %v4676_v28 }
 0x54e   : > { %v1783_v17 = vor.u32 %v1782_v42, %v1781_v0  ;;  %vm1788_vm12 = vcmp.lt.s32.totalorder %v4642_v10, 2  ;;  %v1786_v13 = vor.u32 %v1785_v44, %v1784_v59  ;;  %vm1789_vm13 = vcmp.lt.s32.totalorder %v4642_v10, 3  ;;  %v3906_v59 = vld [vmem:[%s4327_s28 + $0x18] sm:$0xff] }
 0x54f   : > { %vm1790_vm14 = vcmp.lt.s32.totalorder %v4642_v10, 4  ;;  %v1795_v51 = vsel %vm1787_vm10, %v1774_v62, %v1777_v55  ;;  %v1711_v18 = vsel %vm1709_vm11, %v1710_v60, %v4676_v28  ;;  %v1799_v3 = vsel %vm1787_vm10, %v1777_v55, %v1780_v49 }
 0x550   : > { %v1792_v61 = vsel %vm1790_vm14, %v1780_v49, 2102212464  ;;  %v1796_v24 = vsel %vm1790_vm14, %v1783_v17, 920167782  ;;  %v1712_v5 = vadd.s32 %v1711_v18, %v1707_v46  ;;  %v1791_v8 = vsel %vm1787_vm10, %v1771_v56, %v1774_v62  ;;  %v981_v46 = vpop.permute.xlu0 %980 }
 0x551   : > { %v1797_v9 = vsel %vm1789_vm13, %v1780_v49, %v1796_v24  ;;  %v1800_v11 = vsel %vm1790_vm14, %v1786_v13, 1326507024  ;;  %v1793_v15 = vsel %vm1789_vm13, %v1777_v55, %v1792_v61  ;;  %v1868_v53 = vadd.s32 1, %v4648_v43 }
 0x552   : > { %v1798_v63 = vsel %vm1788_vm12, %v1795_v51, %v1797_v9  ;;  %v1801_v16 = vsel %vm1789_vm13, %v1783_v17, %v1800_v11  ;;  %v1713_v19 = vadd.s32 536870912, %v1712_v5  ;;  %v1630_v55 = vadd.f32 %v4619_v52, %v4621_v54 }
 0x553   : > { %v1802_v20 = vsel %vm1788_vm12, %v1799_v3, %v1801_v16  ;;  %v4705_v25 = vmul.u32.u64.low %v4644_v12, %v1798_v63  ;;  %v4706_v22 = vmul.u32.u64.high %v4644_v12, %v1798_v63, %v4705_v25  ;;  %vm1869_vm15 = vcmp.gt.s32.totalorder %v1868_v53, 0 }
 0x554   : > { %v4709_v28 = vmul.u32.u64.low %v4644_v12, %v1802_v20  ;;  %v4710_v62 = vmul.u32.u64.high %v4644_v12, %v1802_v20, %v4709_v28  ;;  %v1714_v58 = vshrl.u32 %v1713_v19, 30  ;;  %v1794_v43 = vsel %vm1788_vm12, %v1791_v8, %v1793_v15  ;;  %v3907_v8 = vld [vmem:[%s4343_s17] sm:$0xff] }
 0x555   : > { %v1870_v1 = vsel %vm1869_vm15, %v1868_v53, 0  ;;  %v1813_v0 = vadd.s32 1, %v4706_v22  ;;  %v1865_v42 = vand.u32 8388607, %v1858_v23  ;;  %v1810_v49 = vmul.u32 %v4644_v12, %v1794_v43 }
 0x556   : > { %v1715_v56 = vshll.u32 %v1714_v58, 30  ;;  %v1872_v44 = vand.u32 31, %v1870_v1  ;;  %vm1812_vm1 = vc.u32 %v4710_v62, %v4705_v25  ;;  %v4722_v52 = vadd.f32 %v3906_v59, %v1630_v55 }
 0x557   : > { %v1077_v54 = vadd.f32 %v4595_v31, %v981_v46  ;;  %v1814_v60 = vsel %vm1812_vm1, %v1813_v0, %v4706_v22  ;;  %v1866_v51 = vor.u32 8388608, %v1865_v42  ;;  %v1738_v61 = vsub.s32 4, %v1714_v58 }
 0x558   : > { %v1716_v10 = vsub.s32 %v1712_v5, %v1715_v56  ;;  %v1815_v17 = vadd.s32 %v1814_v60, %v1810_v49  ;;  %v1873_v18 = vsub.s32 32, %v1872_v44  ;;  %v1964_v3 = vand.u32 2139095040, %v4722_v52 }
 0x559   : > { %v4728_v12 = vadd.f32 %v3907_v8, %v1077_v54  ;;  %v4731_v9 = vadd.f32 %v4597_v32, %v981_v46  ;;  %v1961_v15 = vand.u32 2147483647, %v4722_v52  ;;  %v4745_v63 = vadd.f32 %v4630_v4, %v4697_v14 }
 0x55a   : > { %v1718_v13 = vsub.s32 0, %v1716_v10  ;;  %v1816_v24 = vadd.s32 536870912, %v1815_v17  ;;  %v1708_v32 = vadd.s32 %v4675_v33, %v4672_v26  ;;  %v1876_v53 = vshrl.u32 %v4092_v45, %v1873_v18 }
 0x55b   : > { %v4750_v19 = vshll.u32 %v1866_v51, 8  ;;  %v1739_v50 = vsel %vm1654_vm2, %v1738_v61, %v1714_v58  ;;  %v4755_v22 = vshrl.u32 %v1870_v1, 5  ;;  %v1965_v28 = vshrl.u32 %v1964_v3, 23 }
 0x55c   : > { %v3553_v31 = vmin.u32 %v1718_v13, %v1716_v10  ;;  %v4740_v11 = vshrl.u32 %v1816_v24, 30  ;;  %v1875_v4 = vshll.u32 %v4091_v21, %v1872_v44  ;;  %v1879_v43 = vshrl.u32 %v4093_v27, %v1873_v18 }
 0x55d   : > { %v1885_v26 = vshrl.u32 %v4095_v29, %v1873_v18  ;;  %v1811_v33 = vadd.s32 %v4705_v25, %v4710_v62  ;;  %v1878_v0 = vshll.u32 %v4092_v45, %v1872_v44  ;;  %v1882_v58 = vshrl.u32 %v4094_v35, %v1873_v18 }
 0x55e   : > { %v1720_v16 = vclz %v3553_v31  ;;  %v1818_v20 = vshll.u32 %v4740_v11, 30  ;;  %v4767_v1 = vsel %vm4736_vm3, 0, %v1739_v50  ;;  %v1877_v42 = vor.u32 %v1876_v53, %v1875_v4 }
 0x55f   : > { %v1884_v46 = vshll.u32 %v4094_v35, %v1872_v44  ;;  %v1881_v54 = vshll.u32 %v4093_v27, %v1872_v44  ;;  %v1888_v25 = vshrl.u32 %v4096_v41, %v1873_v18  ;;  %v1874_v61 = vshrl.u32 %v4091_v21, %v1873_v18 }
 0x560   : > { %v3554_v55 = vadd.s32 4294967294, %v1720_v16  ;;  %v4761_v56 = vsub.s32 %v1815_v17, %v1818_v20  ;;  %v1880_v17 = vor.u32 %v1879_v43, %v1878_v0  ;;  %v1887_v3 = vshll.u32 %v4095_v29, %v1872_v44 }
 0x561   : > { %v1886_v13 = vor.u32 %v1885_v26, %v1884_v46  ;;  %v1883_v24 = vor.u32 %v1882_v58, %v1881_v54  ;;  %v1841_v53 = vsub.s32 4, %v4740_v11  ;;  %vm1890_vm5 = vcmp.lt.s32.totalorder %v4755_v22, 1 }
 0x562   : > { %vm3555_vm4 = vcmp.lt.s32.totalorder %v3554_v55, 0  ;;  %v1821_v59 = vsub.s32 0, %v4761_v56  ;;  %v1889_v20 = vor.u32 %v1888_v25, %v1887_v3  ;;  %vm1893_vm6 = vcmp.lt.s32.totalorder %v4755_v22, 4 }
 0x563   : > { %v1723_v49 = vsel %vm3555_vm4, 0, %v3554_v55  ;;  %v1898_v43 = vsel %vm1890_vm5, %v1877_v42, %v1880_v17  ;;  %v1899_v18 = vsel %vm1893_vm6, %v1886_v13, 920167782  ;;  %vm1891_vm7 = vcmp.lt.s32.totalorder %v4755_v22, 2 }
 0x564   : > { %v1724_v62 = vsub.s32 32, %v1723_v49  ;;  %v1728_v60 = vsub.s32 4294967266, %v1723_v49  ;;  %v3557_v51 = vmin.u32 %v1821_v59, %v4761_v56  ;;  %v1725_v8 = vshll.u32 %v1716_v10, %v1723_v49 }
 0x565   : > { %vm1892_vm8 = vcmp.lt.s32.totalorder %v4755_v22, 3  ;;  %v1894_v10 = vsel %vm1890_vm5, %v1874_v61, %v1877_v42  ;;  %vm4786_vm9 = vcmp.le.f32.partialorder %v1755_v57, 0.7853982  ;;  %v1895_v0 = vsel %vm1893_vm6, %v1883_v24, 2102212464 }
 0x566   : > { %v1726_v31 = vshrl.u32 %v1708_v32, %v1724_v62  ;;  %v1729_v16 = vadd.s32 127, %v1728_v60  ;;  %v1823_v50 = vclz %v3557_v51  ;;  %v1900_v58 = vsel %vm1892_vm8, %v1883_v24, %v1899_v18 }
 0x567   : > { %v1902_v46 = vsel %vm1890_vm5, %v1880_v17, %v1883_v24  ;;  %v1901_v59 = vsel %vm1891_vm7, %v1898_v43, %v1900_v58  ;;  %v1903_v42 = vsel %vm1893_vm6, %v1889_v20, 1326507024  ;;  %v3564_v62 = vadd.s32 4294967169, %v1965_v28 }
 0x568   : > { %v1727_v55 = vor.u32 %v1726_v31, %v1725_v8  ;;  %v1730_v4 = vshll.u32 %v1729_v16, 23  ;;  %v3558_v44 = vadd.s32 4294967294, %v1823_v50  ;;  %v1904_v25 = vsel %vm1892_vm8, %v1886_v13, %v1903_v42 }
 0x569   : > { %v1896_v61 = vsel %vm1892_vm8, %v1880_v17, %v1895_v0  ;;  %v1905_v24 = vsel %vm1891_vm7, %v1902_v46, %v1904_v25  ;;  %v4810_v13 = vmul.u32.u64.low %v4750_v19, %v1901_v59  ;;  %v4811_v28 = vmul.u32.u64.high %v4750_v19, %v1901_v59, %v4810_v13 }
 0x56a   : > { %v1731_v32 = vor.u32 4788187, %v1730_v4  ;;  %v1734_v49 = vcvt.s32.f32 %v1727_v55  ;;  %vm3559_vm10 = vcmp.lt.s32.totalorder %v3558_v44, 0  ;;  %v4813_v55 = vpop.permute.xlu1 %1540  ;;  %v2585_v17 = vadd.s32 3, %v4767_v1 }
 0x56b   : > { %v1826_v57 = vsel %vm3559_vm10, 0, %v3558_v44  ;;  %v4806_v31 = vmul.u32.u64.low %v4750_v19, %v1905_v24  ;;  %v4807_v16 = vmul.u32.u64.high %v4750_v19, %v1905_v24, %v4806_v31  ;;  %v1842_v43 = vsel %vm1757_vm0, %v1841_v53, %v4740_v11 }
 0x56c   : > { %v1732_v54 = vand.u32 2147483647, %v1731_v32  ;;  %v1827_v60 = vsub.s32 32, %v1826_v57  ;;  %v1831_v51 = vsub.s32 4294967266, %v1826_v57  ;;  %v1828_v8 = vshll.u32 %v4761_v56, %v1826_v57 }
 0x56d   : > { %v1971_v56 = vadd.s32 1, %v3564_v62  ;;  %v1968_v32 = vand.u32 8388607, %v1961_v15  ;;  %v4826_v58 = vand.u32 3, %v4767_v1  ;;  %vm1915_vm11 = vc.u32 %v4807_v16, %v4810_v13 }
 0x56e   : > { %v1735_v3 = vmul.f32 %v1734_v49, %v1732_v54  ;;  %v1829_v50 = vshrl.u32 %v1811_v33, %v1827_v60  ;;  %v1832_v20 = vadd.s32 127, %v1831_v51  ;;  %v1897_v33 = vsel %vm1891_vm7, %v1894_v10, %v1896_v61  ;;  %v4839_v54 = vpop.permute.xlu1 %985  ;;  %v3908_v51 = vld [vmem:[%s4343_s17 + $0x8] sm:$0xff] }
 0x56f   : > { %vm1972_vm12 = vcmp.gt.s32.totalorder %v1971_v56, 0  ;;  %v1844_v22 = vsel %vm4786_vm9, 0, %v1842_v43  ;;  %v1916_v10 = vadd.s32 1, %v4811_v28  ;;  %v4835_v46 = vand.u32 3, %v2585_v17 }
 0x570   : > { %v1736_v4 = vxor.u32 2147483648, %v1735_v3  ;;  %v1830_v18 = vor.u32 %v1829_v50, %v1828_v8  ;;  %v1833_v44 = vshll.u32 %v1832_v20, 23  ;;  %v1913_v1 = vmul.u32 %v4750_v19, %v1897_v33 }
 0x571   : > { %v1973_v49 = vsel %vm1972_vm12, %v1971_v56, 0  ;;  %v1917_v5 = vsel %vm1915_vm11, %v1916_v10, %v4811_v28  ;;  %v2689_v57 = vadd.s32 3, %v1844_v22  ;;  %v1969_v62 = vor.u32 8388608, %v1968_v32 }
 0x572   : > { %v1737_v0 = vsel %vm1654_vm2, %v1736_v4, %v1735_v3  ;;  %v1834_v53 = vor.u32 4788187, %v1833_v44  ;;  %v1837_v42 = vcvt.s32.f32 %v1830_v18  ;;  %v1918_v25 = vadd.s32 %v1917_v5, %v1913_v1  ;;  %v3909_v3 = vld [vmem:[%s4327_s28 + $0x20] sm:$0xff] }
 0x573   : > { %v1740_v11 = vsel %vm4736_vm3, %v4612_v47, %v1737_v0  ;;  %v1975_v60 = vand.u32 31, %v1973_v49  ;;  %v4843_v61 = vadd.f32 %v3908_v51, %v4731_v9  ;;  %v4847_v24 = vadd.f32 %v4599_v34, %v4839_v54 }
 0x574   : > { %3874 = vcosq.f32 %v1740_v11  ;;  %v1835_v59 = vand.u32 2147483647, %v1834_v53  ;;  %v4851_v8 = vadd.f32 %v3909_v3, %v4745_v63  ;;  %vm1750_vm13 = vcmp.eq.s32.totalorder %v4826_v58, 2 }
 0x575   : > { %3876 = vsinq.f32 %v1740_v11  ;;  %v1919_v31 = vadd.s32 536870912, %v1918_v25  ;;  %v4854_v50 = vsub.s32 32, %v1975_v60  ;;  %v4858_v20 = vadd.f32 %v4635_v7, %v4697_v14 }
 0x576   : > { %v1838_v19 = vmul.f32 %v1837_v42, %v1835_v59  ;;  %vm1747_vm14 = vcmp.eq.s32.totalorder %v4826_v58, 0  ;;  %vm2588_vm15 = vcmp.eq.s32.totalorder %v4835_v46, 0  ;;  %vm2591_vm1 = vcmp.eq.s32.totalorder %v4835_v46, 2 }
 0x577   : > { %v4863_v9 = vshrl.u32 %v1973_v49, 5  ;;  %vm1746_vm2 = vcmp.lt.s32.totalorder %v4826_v58, 2  ;;  %vm2587_vm3 = vcmp.lt.s32.totalorder %v4835_v46, 2  ;;  %v4867_v63 = vand.u32 3, %v1844_v22 }
 0x578   : > { %v1839_v34 = vxor.u32 2147483648, %v1838_v19  ;;  %v4869_v28 = vand.u32 3, %v2689_v57  ;;  %vm1860_vm4 = vcmp.lt.s32.totalorder %v4633_v6, 0  ;;  %v1920_v7 = vshrl.u32 %v1919_v31, 30 }
 0x579   : > { %v4872_v14 = vshll.u32 %v1969_v62, 8  ;;  %vm1744_vm5 = vweird.f32 %v4612_v47  ;;  %v4878_v17 = vadd.s32 %v4810_v13, %v4807_v16  ;;  %v2064_v43 = vand.u32 2147483647, %v4851_v8 }
 0x57a   : > { %v1840_v4 = vsel %vm1757_vm0, %v1839_v34, %v1838_v19  ;;  %v2067_v56 = vand.u32 2139095040, %v4851_v8  ;;  %v1921_v44 = vshll.u32 %v1920_v7, 30  ;;  %v1978_v33 = vshll.u32 %v4091_v21, %v1975_v60 }
 0x57b   : > { %v1843_v18 = vsel %vm4786_vm9, %v4615_v48, %v1840_v4  ;;  %v1979_v32 = vshrl.u32 %v4092_v45, %v4854_v50  ;;  %v1981_v0 = vshll.u32 %v4092_v45, %v1975_v60  ;;  %v1982_v16 = vshrl.u32 %v4093_v27, %v4854_v50 }
 0x57c   : > { %3878 = vcosq.f32 %v1843_v18  ;;  %v1988_v13 = vshrl.u32 %v4095_v29, %v4854_v50  ;;  %vm1993_vm0 = vcmp.lt.s32.totalorder %v4863_v9, 1  ;;  %vm4896_vm6 = vcmp.le.f32.partialorder %v1858_v23, 0.7853982 }
 0x57d   : > { %3880 = vsinq.f32 %v1843_v18  ;;  %v4900_v53 = vsub.s32 %v1918_v25, %v1921_v44  ;;  %v1984_v22 = vshll.u32 %v4093_v27, %v1975_v60  ;;  %v1985_v10 = vshrl.u32 %v4094_v35, %v4854_v50 }
 0x57e   : > { %v3875_v11 = vpop.eup %3874  ;;  %v1944_v59 = vsub.s32 4, %v1920_v7  ;;  %v1987_v42 = vshll.u32 %v4094_v35, %v1975_v60  ;;  %v1991_v5 = vshrl.u32 %v4096_v41, %v4854_v50  ;;  %v1980_v62 = vor.u32 %v1979_v32, %v1978_v33 }
 0x57f   : > { %v3877_v1 = vpop.eup %3876  ;;  %v1751_v49 = vxor.u32 2147483648, %v3875_v11  ;;  %v1924_v23 = vsub.s32 0, %v4900_v53  ;;  %v1990_v25 = vshll.u32 %v4095_v29, %v1975_v60  ;;  %vm1853_vm7 = vcmp.eq.s32.totalorder %v4867_v63, 2 }
 0x580   : > { %v1748_v57 = vxor.u32 2147483648, %v3877_v1  ;;  %vm2695_vm8 = vcmp.eq.s32.totalorder %v4869_v28, 2  ;;  %v4916_v3 = vor.u32 %v1982_v16, %v1981_v0  ;;  %v1989_v31 = vor.u32 %v1988_v13, %v1987_v42 }
 0x581   : > { %v1752_v51 = vsel %vm1750_vm13, %v1751_v49, %v3877_v1  ;;  %v2593_v19 = vsel %vm2591_vm1, %v1751_v49, %v3877_v1  ;;  %vm1850_vm9 = vcmp.eq.s32.totalorder %v4867_v63, 0  ;;  %vm2692_vm10 = vcmp.eq.s32.totalorder %v4869_v28, 0 }
 0x582   : > { %v1749_v34 = vsel %vm1747_vm14, %v3875_v11, %v1748_v57  ;;  %v2590_v4 = vsel %vm2588_vm15, %v3875_v11, %v1748_v57  ;;  %v3561_v60 = vmin.u32 %v1924_v23, %v4900_v53  ;;  %v1986_v18 = vor.u32 %v1985_v10, %v1984_v22 }
 0x583   : > { %v1753_v44 = vsel %vm1746_vm2, %v1749_v34, %v1752_v51  ;;  %v2594_v33 = vsel %vm2587_vm3, %v2590_v4, %v2593_v19  ;;  %vm1849_vm11 = vcmp.lt.s32.totalorder %v4867_v63, 2  ;;  %vm2691_vm12 = vcmp.lt.s32.totalorder %v4869_v28, 2 }
 0x584   : > { %v1945_v32 = vsel %vm1860_vm4, %v1944_v59, %v1920_v7  ;;  %v1992_v0 = vor.u32 %v1991_v5, %v1990_v25  ;;  %v1754_v16 = vsel %vm1744_vm5, nan, %v1753_v44  ;;  %v2595_v58 = vsel %vm1744_vm5, nan, %v2594_v33 }
 0x585   : > { %vm1847_vm13 = vweird.f32 %v4615_v48  ;;  %v1926_v46 = vclz %v3561_v60  ;;  %vm1996_vm14 = vcmp.lt.s32.totalorder %v4863_v9, 4  ;;  %v2476_v13 = vmul.f32 %v1754_v16, %v4728_v12 }
 0x586   : > { %v3324_v11 = vmul.f32 %v2595_v58, %v4728_v12  ;;  %vm1994_vm15 = vcmp.lt.s32.totalorder %v4863_v9, 2  ;;  %v2002_v7 = vsel %vm1996_vm14, %v1989_v31, 920167782  ;;  %v1977_v47 = vshrl.u32 %v4091_v21, %v4854_v50  ;;  %v3879_v1 = vpop.eup %3878 }
 0x587   : > { %v3562_v22 = vadd.s32 4294967294, %v1926_v46  ;;  %vm1995_vm1 = vcmp.lt.s32.totalorder %v4863_v9, 3  ;;  %v2001_v10 = vsel %vm1993_vm0, %v1980_v62, %v4916_v3  ;;  %2484 = vst [vmem:[%s4951_s16] sm:$0xff] %v2476_v13  ;;  %v1947_v12 = vsel %vm4896_vm6, 0, %v1945_v32  ;;  %v3881_v42 = vpop.eup %3880 }
 0x588   : > { %3332 = vst [vmem:[%s4955_s0] sm:$0xff] %v3324_v11  ;;  %v2003_v50 = vsel %vm1995_vm1, %v1986_v18, %v2002_v7  ;;  %v2005_v49 = vsel %vm1993_vm0, %v4916_v3, %v1986_v18  ;;  %v2006_v59 = vsel %vm1996_vm14, %v1992_v0, 1326507024  ;;  %v1854_v5 = vxor.u32 2147483648, %v3879_v1 }
 0x589   : > { %vm3563_vm2 = vcmp.lt.s32.totalorder %v3562_v22, 0  ;;  %v1997_v57 = vsel %vm1993_vm0, %v1977_v47, %v1980_v62  ;;  %v2007_v23 = vsel %vm1995_vm1, %v1989_v31, %v2006_v59  ;;  %v1851_v25 = vxor.u32 2147483648, %v3881_v42 }
 0x58a   : > { %v1929_v51 = vsel %vm3563_vm2, 0, %v3562_v22  ;;  %v1998_v19 = vsel %vm1996_vm14, %v1986_v18, 2102212464  ;;  %v2004_v34 = vsel %vm1994_vm15, %v2001_v10, %v2003_v50  ;;  %v1855_v4 = vsel %vm1853_vm7, %v1854_v5, %v3881_v42 }
 0x58b   : > { %v2697_v60 = vsel %vm2695_vm8, %v1854_v5, %v3881_v42  ;;  %v1930_v44 = vsub.s32 32, %v1929_v51  ;;  %v2008_v62 = vsel %vm1994_vm15, %v2005_v49, %v2007_v23  ;;  %v1852_v31 = vsel %vm1850_vm9, %v3879_v1, %v1851_v25 }
 0x58c   : > { %v2694_v33 = vsel %vm2692_vm10, %v3879_v1, %v1851_v25  ;;  %v1934_v18 = vsub.s32 4294967266, %v1929_v51  ;;  %v2068_v32 = vshrl.u32 %v2067_v56, 23  ;;  %v1856_v0 = vsel %vm1849_vm11, %v1852_v31, %v1855_v4  ;;  %v3911_v25 = vld [vmem:[%s4343_s17 + $0x10] sm:$0xff] }
 0x58d   : > { %v2698_v16 = vsel %vm2691_vm12, %v2694_v33, %v2697_v60  ;;  %v1931_v58 = vshll.u32 %v4900_v53, %v1929_v51  ;;  %v1932_v46 = vshrl.u32 %v4878_v17, %v1930_v44  ;;  %v1857_v13 = vsel %vm1847_vm13, nan, %v1856_v0 }
 0x58e   : > { %v2699_v11 = vsel %vm1847_vm13, nan, %v2698_v16  ;;  %v1935_v7 = vadd.s32 127, %v1934_v18  ;;  %v3568_v56 = vadd.s32 4294967169, %v2068_v32  ;;  %v2477_v63 = vmul.f32 %v1857_v13, %v4843_v61 }
 0x58f   : > { %v3325_v22 = vmul.f32 %v2699_v11, %v4843_v61  ;;  %v1933_v28 = vor.u32 %v1932_v46, %v1931_v58  ;;  %v1999_v53 = vsel %vm1995_vm1, %v4916_v3, %v1998_v19  ;;  %v2793_v1 = vadd.s32 3, %v1947_v12  ;;  %v3910_v3 = vld [vmem:[%s4327_s28 + $0x28] sm:$0xff] }
 0x590   : > { %v1936_v17 = vshll.u32 %v1935_v7, 23  ;;  %v5003_v47 = vmul.u32.u64.low %v4872_v14, %v2008_v62  ;;  %v5004_v10 = vmul.u32.u64.high %v4872_v14, %v2008_v62, %v5003_v47  ;;  %v2074_v48 = vadd.s32 1, %v3568_v56  ;;  %2485 = vst [vmem:[%s4951_s16 + $0x8] sm:$0xff] %v2477_v63 }
 0x591   : > { %3333 = vst [vmem:[%s4955_s0 + $0x8] sm:$0xff] %v3325_v22  ;;  %v5009_v50 = vmul.u32.u64.low %v4872_v14, %v2004_v34  ;;  %v5010_v49 = vmul.u32.u64.high %v4872_v14, %v2004_v34, %v5009_v50  ;;  %v5015_v59 = vand.u32 8388607, %v2064_v43  ;;  %v5019_v42 = vadd.f32 %v3910_v3, %v4858_v20 }
 0x592   : > { %v1937_v61 = vor.u32 4788187, %v1936_v17  ;;  %vm2075_vm3 = vcmp.gt.s32.totalorder %v2074_v48, 0  ;;  %v2000_v5 = vsel %vm1994_vm15, %v1997_v57, %v1999_v53  ;;  %v5025_v51 = vadd.f32 %v3911_v25, %v4847_v24 }
 0x593   : > { %v2076_v23 = vsel %vm2075_vm3, %v2074_v48, 0  ;;  %v1940_v34 = vcvt.s32.f32 %v1933_v28  ;;  %vm2018_vm5 = vc.u32 %v5004_v10, %v5009_v50  ;;  %v5029_v4 = vand.u32 3, %v1947_v12 }
 0x594   : > { %v1938_v19 = vand.u32 2147483647, %v1937_v61  ;;  %v5031_v60 = vand.u32 3, %v2793_v1  ;;  %v2019_v20 = vadd.s32 1, %v5010_v49  ;;  %v2078_v44 = vand.u32 31, %v2076_v23 }
 0x595   : > { %v2016_v9 = vmul.u32 %v4872_v14, %v2000_v5  ;;  %v2072_v57 = vor.u32 8388608, %v5015_v59  ;;  %v2170_v24 = vand.u32 2139095040, %v5019_v42  ;;  %v2077_v33 = vshrl.u32 %v2076_v23, 5 }
 0x596   : > { %v1941_v62 = vmul.f32 %v1940_v34, %v1938_v19  ;;  %v2020_v31 = vsel %vm2018_vm5, %v2019_v20, %v5010_v49  ;;  %v2079_v18 = vsub.s32 32, %v2078_v44  ;;  %v2081_v32 = vshll.u32 %v4091_v21, %v2078_v44 }
 0x597   : > { %v2021_v0 = vadd.s32 %v2020_v31, %v2016_v9  ;;  %v2084_v16 = vshll.u32 %v4092_v45, %v2078_v44  ;;  %v2087_v58 = vshll.u32 %v4093_v27, %v2078_v44  ;;  %v2090_v11 = vshll.u32 %v4094_v35, %v2078_v44 }
 0x598   : > { %v1942_v12 = vxor.u32 2147483648, %v1941_v62  ;;  %v2082_v46 = vshrl.u32 %v4092_v45, %v2079_v18  ;;  %v2085_v14 = vshrl.u32 %v4093_v27, %v2079_v18  ;;  %v2088_v13 = vshrl.u32 %v4094_v35, %v2079_v18 }
 0x599   : > { %v2022_v56 = vadd.s32 536870912, %v2021_v0  ;;  %v2091_v63 = vshrl.u32 %v4095_v29, %v2079_v18  ;;  %v2093_v22 = vshll.u32 %v4095_v29, %v2078_v44  ;;  %vm1963_vm0 = vcmp.lt.s32.totalorder %v4722_v52, 0 }
 0x59a   : > { %v1943_v7 = vsel %vm1860_vm4, %v1942_v12, %v1941_v62  ;;  %v2083_v53 = vor.u32 %v2082_v46, %v2081_v32  ;;  %v2086_v17 = vor.u32 %v2085_v14, %v2084_v16  ;;  %v2089_v47 = vor.u32 %v2088_v13, %v2087_v58 }
 0x59b   : > { %v1946_v28 = vsel %vm4896_vm6, %v4633_v6, %v1943_v7  ;;  %v2023_v48 = vshrl.u32 %v2022_v56, 30  ;;  %v2092_v1 = vor.u32 %v2091_v63, %v2090_v11  ;;  %v2094_v49 = vshrl.u32 %v4096_v41, %v2079_v18 }
 0x59c   : > { %3882 = vcosq.f32 %v1946_v28  ;;  %vm2096_vm4 = vcmp.lt.s32.totalorder %v2077_v33, 1  ;;  %vm2097_vm7 = vcmp.lt.s32.totalorder %v2077_v33, 2  ;;  %v2171_v61 = vshrl.u32 %v2170_v24, 23 }
 0x59d   : > { %3884 = vsinq.f32 %v1946_v28  ;;  %vm5056_vm8 = vcmp.le.f32.partialorder %v1961_v15, 0.7853982  ;;  %v2024_v26 = vshll.u32 %v2023_v48, 30  ;;  %v2095_v3 = vor.u32 %v2094_v49, %v2093_v22 }
 0x59e   : > { %vm2099_vm6 = vcmp.lt.s32.totalorder %v2077_v33, 4  ;;  %v2104_v5 = vsel %vm2096_vm4, %v2083_v53, %v2086_v17  ;;  %v2080_v23 = vshrl.u32 %v4091_v21, %v2079_v18  ;;  %vm2098_vm9 = vcmp.lt.s32.totalorder %v2077_v33, 3 }
 0x59f   : > { %v2101_v25 = vsel %vm2099_vm6, %v2089_v47, 2102212464  ;;  %v2105_v19 = vsel %vm2099_vm6, %v2092_v1, 920167782  ;;  %v5062_v34 = vsub.s32 %v2021_v0, %v2024_v26  ;;  %v2047_v20 = vsub.s32 4, %v2023_v48 }
 0x5a0   : > { %v2106_v44 = vsel %vm2098_vm9, %v2089_v47, %v2105_v19  ;;  %v2108_v62 = vsel %vm2096_vm4, %v2086_v17, %v2089_v47  ;;  %v2100_v15 = vsel %vm2096_vm4, %v2080_v23, %v2083_v53  ;;  %v2109_v24 = vsel %vm2099_vm6, %v2095_v3, 1326507024 }
 0x5a1   : > { %v2107_v9 = vsel %vm2097_vm7, %v2104_v5, %v2106_v44  ;;  %v2112_v31 = vshll.u32 %v2072_v57, 8  ;;  %vm1952_vm10 = vcmp.lt.s32.totalorder %v5029_v4, 2  ;;  %v2027_v32 = vsub.s32 0, %v5062_v34 }
 0x5a2   : > { %v2102_v18 = vsel %vm2098_vm9, %v2086_v17, %v2101_v25  ;;  %v2110_v12 = vsel %vm2098_vm9, %v2092_v1, %v2109_v24  ;;  %v3572_v16 = vadd.s32 4294967169, %v2171_v61  ;;  %vm1950_vm11 = vweird.f32 %v4633_v6 }
 0x5a3   : > { %vm1953_vm12 = vcmp.eq.s32.totalorder %v5029_v4, 0  ;;  %v2111_v0 = vsel %vm2097_vm7, %v2108_v62, %v2110_v12  ;;  %v5072_v58 = vmul.u32.u64.low %v2112_v31, %v2107_v9  ;;  %v5073_v46 = vmul.u32.u64.high %v2112_v31, %v2107_v9, %v5072_v58 }
 0x5a4   : > { %vm1956_vm13 = vcmp.eq.s32.totalorder %v5029_v4, 2  ;;  %vm2795_vm14 = vcmp.lt.s32.totalorder %v5031_v60, 2  ;;  %v3565_v57 = vmin.u32 %v2027_v32, %v5062_v34  ;;  %v2048_v14 = vsel %vm1963_vm0, %v2047_v20, %v2023_v48 }
 0x5a5   : > { %vm2796_vm15 = vcmp.eq.s32.totalorder %v5031_v60, 0  ;;  %v2103_v13 = vsel %vm2097_vm7, %v2100_v15, %v2102_v18  ;;  %v5083_v11 = vmul.u32.u64.low %v2112_v31, %v2111_v0  ;;  %v5084_v7 = vmul.u32.u64.high %v2112_v31, %v2111_v0, %v5083_v11 }
 0x5a6   : > { %v3883_v56 = vpop.eup %3882  ;;  %vm2799_vm1 = vcmp.eq.s32.totalorder %v5031_v60, 2  ;;  %v2029_v63 = vclz %v3565_v57  ;;  %v2177_v22 = vadd.s32 1, %v3572_v16  ;;  %v5089_v28 = vadd.f32 %v4681_v30, %v4813_v55 }
 0x5a7   : > { %v3885_v53 = vpop.eup %3884  ;;  %v1957_v17 = vxor.u32 2147483648, %v3883_v56  ;;  %v2017_v47 = vadd.s32 %v5009_v50, %v5004_v10  ;;  %v2050_v33 = vsel %vm5056_vm8, 0, %v2048_v14  ;;  %v2167_v48 = vand.u32 2147483647, %v5019_v42 }
 0x5a8   : > { %v1954_v1 = vxor.u32 2147483648, %v3885_v53  ;;  %v3566_v49 = vadd.s32 4294967294, %v2029_v63  ;;  %v2119_v61 = vmul.u32 %v2112_v31, %v2103_v13  ;;  %v2122_v26 = vadd.s32 1, %v5073_v46  ;;  %v5126_v13 = vpop.permute.xlu0 %990  ;;  %v3912_v63 = vld [vmem:[%s4343_s17 + $0x18] sm:$0xff] }
 0x5a9   : > { %v1958_v3 = vsel %vm1956_vm13, %v1957_v17, %v3885_v53  ;;  %v2801_v30 = vsel %vm2799_vm1, %v1957_v17, %v3885_v53  ;;  %vm2121_vm2 = vc.u32 %v5084_v7, %v5072_v58  ;;  %vm2178_vm3 = vcmp.gt.s32.totalorder %v2177_v22, 0 }
 0x5aa   : > { %v1955_v10 = vsel %vm1953_vm12, %v3883_v56, %v1954_v1  ;;  %v2798_v50 = vsel %vm2796_vm15, %v3883_v56, %v1954_v1  ;;  %vm3567_vm5 = vcmp.lt.s32.totalorder %v3566_v49, 0  ;;  %v2123_v5 = vsel %vm2121_vm2, %v2122_v26, %v5073_v46 }
 0x5ab   : > { %v1959_v23 = vsel %vm1952_vm10, %v1955_v10, %v1958_v3  ;;  %v2802_v25 = vsel %vm2795_vm14, %v2798_v50, %v2801_v30  ;;  %v2032_v19 = vsel %vm3567_vm5, 0, %v3566_v49  ;;  %v2124_v20 = vadd.s32 %v2123_v5, %v2119_v61 }
 0x5ac   : > { %v1960_v44 = vsel %vm1950_vm11, nan, %v1959_v23  ;;  %v2803_v62 = vsel %vm1950_vm11, nan, %v2802_v25  ;;  %v2033_v15 = vsub.s32 32, %v2032_v19  ;;  %v2174_v9 = vand.u32 8388607, %v2167_v48 }
 0x5ad   : > { %v2478_v4 = vmul.f32 %v1960_v44, %v5025_v51  ;;  %v3326_v24 = vmul.f32 %v2803_v62, %v5025_v51  ;;  %v2037_v60 = vsub.s32 4294967266, %v2032_v19  ;;  %v2125_v31 = vadd.s32 536870912, %v2124_v20 }
 0x5ae   : > { %v1085_v32 = vadd.f32 %v4601_v36, %v4839_v54  ;;  %v2035_v18 = vshrl.u32 %v2017_v47, %v2033_v15  ;;  %v2179_v12 = vsel %vm2178_vm3, %v2177_v22, 0  ;;  %v1640_v6 = vadd.f32 %v4638_v2, %v4813_v55  ;;  %v3913_v55 = vld [vmem:[%s4327_s28 + $0x30] sm:$0xff] }
 0x5af   : > { %2486 = vst [vmem:[%s4951_s16 + $0x10] sm:$0xff] %v2478_v4  ;;  %3334 = vst [vmem:[%s4955_s0 + $0x10] sm:$0xff] %v3326_v24  ;;  %v2034_v16 = vshll.u32 %v5062_v34, %v2032_v19  ;;  %v2038_v0 = vadd.s32 127, %v2037_v60  ;;  %v2126_v46 = vshrl.u32 %v2125_v31, 30  ;;  %v2181_v51 = vand.u32 31, %v2179_v12 }
 0x5b0   : > { %v2897_v57 = vadd.s32 3, %v2050_v33  ;;  %v2175_v14 = vor.u32 8388608, %v2174_v9  ;;  %v5129_v22 = vadd.f32 %v3912_v63, %v1085_v32  ;;  %v5133_v2 = vadd.f32 %v4603_v37, %v5126_v13 }
 0x5b1   : > { %v2036_v36 = vor.u32 %v2035_v18, %v2034_v16  ;;  %v2039_v54 = vshll.u32 %v2038_v0, 23  ;;  %v2127_v11 = vshll.u32 %v2126_v46, 30  ;;  %v2182_v56 = vsub.s32 32, %v2181_v51 }
 0x5b2   : > { %v5136_v34 = vadd.f32 %v3913_v55, %v1640_v6  ;;  %v5138_v17 = vand.u32 3, %v2050_v33  ;;  %vm2066_vm4 = vcmp.lt.s32.totalorder %v4851_v8, 0  ;;  %v5141_v1 = vand.u32 3, %v2897_v57 }
 0x5b3   : > { %v2040_v53 = vor.u32 4788187, %v2039_v54  ;;  %v2128_v47 = vsub.s32 %v2124_v20, %v2127_v11  ;;  %v2120_v49 = vadd.s32 %v5072_v58, %v5084_v7  ;;  %v2150_v61 = vsub.s32 4, %v2126_v46 }
 0x5b4   : > { %v5145_v26 = vshll.u32 %v2175_v14, 8  ;;  %v2043_v37 = vcvt.s32.f32 %v2036_v36  ;;  %v2191_v10 = vshrl.u32 %v4094_v35, %v2182_v56  ;;  %v2180_v50 = vshrl.u32 %v2179_v12, 5 }
 0x5b5   : > { %v2041_v3 = vand.u32 2147483647, %v2040_v53  ;;  %v2130_v30 = vsub.s32 0, %v2128_v47  ;;  %v2185_v33 = vshrl.u32 %v4092_v45, %v2182_v56  ;;  %v2188_v5 = vshrl.u32 %v4093_v27, %v2182_v56 }
 0x5b6   : > { %v2273_v23 = vand.u32 2139095040, %v5136_v34  ;;  %v2184_v20 = vshll.u32 %v4091_v21, %v2181_v51  ;;  %v2190_v58 = vshll.u32 %v4093_v27, %v2181_v51  ;;  %v2151_v7 = vsel %vm2066_vm4, %v2150_v61, %v2126_v46 }
 0x5b7   : > { %v2044_v25 = vmul.f32 %v2043_v37, %v2041_v3  ;;  %v3569_v19 = vmin.u32 %v2130_v30, %v2128_v47  ;;  %v2187_v44 = vshll.u32 %v4092_v45, %v2181_v51  ;;  %v2193_v62 = vshll.u32 %v4094_v35, %v2181_v51 }
 0x5b8   : > { %v2194_v15 = vshrl.u32 %v4095_v29, %v2182_v56  ;;  %v2192_v24 = vor.u32 %v2191_v10, %v2190_v58  ;;  %v2197_v60 = vshrl.u32 %v4096_v41, %v2182_v56  ;;  %v2186_v31 = vor.u32 %v2185_v33, %v2184_v20 }
 0x5b9   : > { %v2045_v9 = vxor.u32 2147483648, %v2044_v25  ;;  %v2132_v4 = vclz %v3569_v19  ;;  %v2189_v32 = vor.u32 %v2188_v5, %v2187_v44  ;;  %v2196_v12 = vshll.u32 %v4095_v29, %v2181_v51 }
 0x5ba   : > { %v2195_v18 = vor.u32 %v2194_v15, %v2193_v62  ;;  %v2183_v0 = vshrl.u32 %v4091_v21, %v2182_v56  ;;  %vm2199_vm7 = vcmp.lt.s32.totalorder %v2180_v50, 1  ;;  %vm2200_vm6 = vcmp.lt.s32.totalorder %v2180_v50, 2 }
 0x5bb   : > { %v2046_v6 = vsel %vm1963_vm0, %v2045_v9, %v2044_v25  ;;  %v3570_v16 = vadd.s32 4294967294, %v2132_v4  ;;  %v2198_v57 = vor.u32 %v2197_v60, %v2196_v12  ;;  %vm2202_vm9 = vcmp.lt.s32.totalorder %v2180_v50, 4 }
 0x5bc   : > { %v2049_v46 = vsel %vm5056_vm8, %v4722_v52, %v2046_v6  ;;  %vm5168_vm10 = vcmp.le.f32.partialorder %v2064_v43, 0.7853982  ;;  %vm2201_vm0 = vcmp.lt.s32.totalorder %v2180_v50, 3  ;;  %v2204_v51 = vsel %vm2202_vm9, %v2192_v24, 2102212464 }
 0x5bd   : > { %3886 = vcosq.f32 %v2049_v46  ;;  %vm3571_vm11 = vcmp.lt.s32.totalorder %v3570_v16, 0  ;;  %v2207_v54 = vsel %vm2199_vm7, %v2186_v31, %v2189_v32  ;;  %v2208_v59 = vsel %vm2202_vm9, %v2195_v18, 920167782 }
 0x5be   : > { %3888 = vsinq.f32 %v2049_v46  ;;  %v2135_v36 = vsel %vm3571_vm11, 0, %v3570_v16  ;;  %v2203_v63 = vsel %vm2199_vm7, %v2183_v0, %v2186_v31  ;;  %v2205_v55 = vsel %vm2201_vm0, %v2189_v32, %v2204_v51 }
 0x5bf   : > { %v2136_v11 = vsub.s32 32, %v2135_v36  ;;  %v2140_v56 = vsub.s32 4294967266, %v2135_v36  ;;  %v2137_v43 = vshll.u32 %v2128_v47, %v2135_v36  ;;  %v2209_v53 = vsel %vm2201_vm0, %v2192_v24, %v2208_v59 }
 0x5c0   : > { %v2211_v61 = vsel %vm2199_vm7, %v2189_v32, %v2192_v24  ;;  %v2212_v3 = vsel %vm2202_vm9, %v2198_v57, 1326507024  ;;  %v2210_v10 = vsel %vm2200_vm6, %v2207_v54, %v2209_v53  ;;  %v2274_v47 = vshrl.u32 %v2273_v23, 23 }
 0x5c1   : > { %v2138_v37 = vshrl.u32 %v2120_v49, %v2136_v11  ;;  %v2141_v30 = vadd.s32 127, %v2140_v56  ;;  %v2213_v33 = vsel %vm2201_vm0, %v2195_v18, %v2212_v3  ;;  %vm2053_vm8 = vweird.f32 %v4722_v52 }
 0x5c2   : > { %v2214_v5 = vsel %vm2200_vm6, %v2211_v61, %v2213_v33  ;;  %v5184_v25 = vmul.u32.u64.low %v5145_v26, %v2210_v10  ;;  %v5185_v19 = vmul.u32.u64.high %v5145_v26, %v2210_v10, %v5184_v25  ;;  %vm2055_vm12 = vcmp.lt.s32.totalorder %v5138_v17, 2 }
 0x5c3   : > { %v2139_v20 = vor.u32 %v2138_v37, %v2137_v43  ;;  %v2142_v58 = vshll.u32 %v2141_v30, 23  ;;  %v5189_v44 = vmul.u32.u64.low %v5145_v26, %v2214_v5  ;;  %v5190_v62 = vmul.u32.u64.high %v5145_v26, %v2214_v5, %v5189_v44 }
 0x5c4   : > { %vm2056_vm13 = vcmp.eq.s32.totalorder %v5138_v17, 0  ;;  %v2206_v49 = vsel %vm2200_vm6, %v2203_v63, %v2205_v55  ;;  %v3576_v15 = vadd.s32 4294967169, %v2274_v47  ;;  %vm2059_vm14 = vcmp.eq.s32.totalorder %v5138_v17, 2  ;;  %v3914_v47 = vld [vmem:[%s4343_s17 + $0x20] sm:$0xff] }
 0x5c5   : > { %vm2899_vm15 = vcmp.lt.s32.totalorder %v5141_v1, 2  ;;  %vm2900_vm1 = vcmp.eq.s32.totalorder %v5141_v1, 0  ;;  %v2143_v23 = vor.u32 4788187, %v2142_v58  ;;  %vm2903_vm2 = vcmp.eq.s32.totalorder %v5141_v1, 2 }
 0x5c6   : > { %v2153_v9 = vsel %vm5168_vm10, 0, %v2151_v7  ;;  %v2225_v4 = vadd.s32 1, %v5185_v19  ;;  %v2280_v24 = vadd.s32 1, %v3576_v15  ;;  %v2146_v50 = vcvt.s32.f32 %v2139_v20 }
 0x5c7   : > { %v3887_v60 = vpop.eup %3886  ;;  %v2144_v31 = vand.u32 2147483647, %v2143_v23  ;;  %v2222_v32 = vmul.u32 %v5145_v26, %v2206_v49  ;;  %vm2224_vm3 = vc.u32 %v5190_v62, %v5184_v25  ;;  %v2270_v16 = vand.u32 2147483647, %v5136_v34 }
 0x5c8   : > { %v3889_v18 = vpop.eup %3888  ;;  %v2060_v12 = vxor.u32 2147483648, %v3887_v60  ;;  %v2226_v6 = vsel %vm2224_vm3, %v2225_v4, %v5185_v19  ;;  %vm2281_vm5 = vcmp.gt.s32.totalorder %v2280_v24, 0  ;;  %v3001_v36 = vadd.s32 3, %v2153_v9 }
 0x5c9   : > { %v2057_v0 = vxor.u32 2147483648, %v3889_v18  ;;  %v2147_v7 = vmul.f32 %v2146_v50, %v2144_v31  ;;  %v2227_v46 = vadd.s32 %v2226_v6, %v2222_v32  ;;  %v2282_v57 = vsel %vm2281_vm5, %v2280_v24, 0 }
 0x5ca   : > { %v2061_v51 = vsel %vm2059_vm14, %v2060_v12, %v3889_v18  ;;  %v2905_v26 = vsel %vm2903_vm2, %v2060_v12, %v3889_v18  ;;  %v2284_v54 = vand.u32 31, %v2282_v57  ;;  %v2277_v53 = vand.u32 8388607, %v2270_v16 }
 0x5cb   : > { %v2058_v59 = vsel %vm2056_vm13, %v3887_v60, %v2057_v0  ;;  %v2902_v11 = vsel %vm2900_vm1, %v3887_v60, %v2057_v0  ;;  %v2148_v56 = vxor.u32 2147483648, %v2147_v7  ;;  %v2228_v63 = vadd.s32 536870912, %v2227_v46 }
 0x5cc   : > { %v2062_v55 = vsel %vm2055_vm12, %v2058_v59, %v2061_v51  ;;  %v2906_v43 = vsel %vm2899_vm15, %v2902_v11, %v2905_v26  ;;  %v2285_v61 = vsub.s32 32, %v2284_v54  ;;  %v5233_v5 = vand.u32 3, %v2153_v9 }
 0x5cd   : > { %v2063_v3 = vsel %vm2053_vm8, nan, %v2062_v55  ;;  %v2907_v37 = vsel %vm2053_vm8, nan, %v2906_v43  ;;  %v2149_v30 = vsel %vm2066_vm4, %v2148_v56, %v2147_v7  ;;  %v2229_v17 = vshrl.u32 %v2228_v63, 30 }
 0x5ce   : > { %v2479_v10 = vmul.f32 %v2063_v3, %v5129_v22  ;;  %v3327_v1 = vmul.f32 %v2907_v37, %v5129_v22  ;;  %v2152_v33 = vsel %vm5168_vm10, %v4851_v8, %v2149_v30  ;;  %v5237_v52 = vadd.f32 %v3914_v47, %v5133_v2 }
 0x5cf   : > { %3890 = vcosq.f32 %v2152_v33  ;;  %v2230_v19 = vshll.u32 %v2229_v17, 30  ;;  %v5241_v20 = vand.u32 3, %v3001_v36  ;;  %vm2169_vm4 = vcmp.lt.s32.totalorder %v5019_v42, 0 }
 0x5d0   : > { %2487 = vst [vmem:[%s4951_s16 + $0x18] sm:$0xff] %v2479_v10  ;;  %3335 = vst [vmem:[%s4955_s0 + $0x18] sm:$0xff] %v3327_v1  ;;  %3892 = vsinq.f32 %v2152_v33  ;;  %v2278_v58 = vor.u32 8388608, %v2277_v53  ;;  %v2288_v14 = vshrl.u32 %v4092_v45, %v2285_v61  ;;  %v5247_v44 = vshrl.u32 %v2282_v57, 5  ;;  %v3915_v57 = vld [vmem:[%s4327_s28 + $0x38] sm:$0xff]  ;;  %s3359_s28 = sshll.u32 %s4951_s16, 4  ;;  %s5482_s28 = int_to_ptr.vmem [resolvable:$true] %s3359_s28 }
 0x5d1   : > { %v5244_v22 = vsub.s32 %v2227_v46, %v2230_v19  ;;  %v2291_v49 = vshrl.u32 %v4093_v27, %v2285_v61  ;;  %v2294_v15 = vshrl.u32 %v4094_v35, %v2285_v61  ;;  %v2297_v2 = vshrl.u32 %v4095_v29, %v2285_v61  ;;  %s3977_s1 = scalar_lea.vmem %s5482_s28, 1024  ;;  %p3984_p13 = scmp.lt.s32.totalorder %s5482_s28, %s3982_s3 }
 0x5d2   : > { %vm2162_vm7 = vcmp.eq.s32.totalorder %v5233_v5, 2  ;;  %v2253_v9 = vsub.s32 4, %v2229_v17  ;;  %v2287_v4 = vshll.u32 %v4091_v21, %v2284_v54  ;;  %v2296_v24 = vshll.u32 %v4094_v35, %v2284_v54  ;;  %p3978_p6 = scmp.ne.s32.totalorder %s5482_s28, %s3977_s1  ;;  %p3985_p3 = scmp.lt.s32.totalorder %s3983_s4, %s3977_s1 }
 0x5d3   : > { %v2233_v23 = vsub.s32 0, %v5244_v22  ;;  %vm2159_vm6 = vcmp.eq.s32.totalorder %v5233_v5, 0  ;;  %vm3004_vm9 = vcmp.eq.s32.totalorder %v5241_v20, 0  ;;  %v2290_v60 = vshll.u32 %v4092_v45, %v2284_v54 }
 0x5d4   : > { %v2293_v31 = vshll.u32 %v4093_v27, %v2284_v54  ;;  %v2299_v50 = vshll.u32 %v4095_v29, %v2284_v54  ;;  %v2300_v32 = vshrl.u32 %v4096_v41, %v2285_v61  ;;  %vm2158_vm10 = vcmp.lt.s32.totalorder %v5233_v5, 2  ;;  %p3979_p8 = pnand %p3978_p6, %p4272_p12  ;;  %p3986_p7 = por %p3985_p3, %p3984_p13 }
 0x5d5   : > { %vm3003_vm11 = vcmp.lt.s32.totalorder %v5241_v20, 2  ;;  %vm3007_vm0 = vcmp.eq.s32.totalorder %v5241_v20, 2  ;;  %v3573_v18 = vmin.u32 %v2233_v23, %v5244_v22  ;;  %v2289_v12 = vor.u32 %v2288_v14, %v2287_v4 }
 0x5d6   : > { %v2298_v6 = vor.u32 %v2297_v2, %v2296_v24  ;;  %vm2156_vm8 = vweird.f32 %v4851_v8  ;;  %v2292_v0 = vor.u32 %v2291_v49, %v2290_v60  ;;  %v2295_v7 = vor.u32 %v2294_v15, %v2293_v31  ;;  %p3980_p10 = pneg %p3979_p8 }
 0x5d7   : > { %v2301_v46 = vor.u32 %v2300_v32, %v2299_v50  ;;  %v5269_v51 = vadd.f32 %v3915_v57, %v5089_v28  ;;  %v2223_v26 = vadd.s32 %v5184_v25, %v5190_v62  ;;  %v2235_v36 = vclz %v3573_v18 }
 0x5d8   : > { %v2286_v54 = vshrl.u32 %v4091_v21, %v2285_v61  ;;  %v5274_v59 = vshll.u32 %v2278_v58, 8  ;;  %v2254_v11 = vsel %vm2169_vm4, %v2253_v9, %v2229_v17  ;;  %vm2302_vm12 = vcmp.lt.s32.totalorder %v5247_v44, 1  ;;  %p3987_p9 = pnand %p3986_p7, %p3980_p10 }
 0x5d9   : > { %vm2303_vm13 = vcmp.lt.s32.totalorder %v5247_v44, 2  ;;  %vm2305_vm14 = vcmp.lt.s32.totalorder %v5247_v44, 4  ;;  %v3891_v56 = vpop.eup %3890  ;;  %v3574_v28 = vadd.s32 4294967294, %v2235_v36  ;;  %vm2304_vm15 = vcmp.lt.s32.totalorder %v5247_v44, 3 }
 0x5da   : > { %v2306_v63 = vsel %vm2302_vm12, %v2286_v54, %v2289_v12  ;;  %v2311_v25 = vsel %vm2305_vm14, %v2298_v6, 920167782  ;;  %v3893_v62 = vpop.eup %3892  ;;  %v2163_v55 = vxor.u32 2147483648, %v3891_v56  ;;  %v2310_v43 = vsel %vm2302_vm12, %v2289_v12, %v2292_v0 }
 0x5db   : > { %v2312_v53 = vsel %vm2304_vm15, %v2295_v7, %v2311_v25  ;;  %v2315_v61 = vsel %vm2305_vm14, %v2301_v46, 1326507024  ;;  %v2160_v3 = vxor.u32 2147483648, %v3893_v62  ;;  %vm3575_vm1 = vcmp.lt.s32.totalorder %v3574_v28, 0 }
 0x5dc   : > { %v2314_v37 = vsel %vm2302_vm12, %v2292_v0, %v2295_v7  ;;  %v2316_v30 = vsel %vm2304_vm15, %v2298_v6, %v2315_v61  ;;  %v2164_v17 = vsel %vm2162_vm7, %v2163_v55, %v3893_v62  ;;  %v3009_v10 = vsel %vm3007_vm0, %v2163_v55, %v3893_v62 }
 0x5dd   : > { %v2238_v1 = vsel %vm3575_vm1, 0, %v3574_v28  ;;  %v2307_v33 = vsel %vm2305_vm14, %v2295_v7, 2102212464  ;;  %v2161_v19 = vsel %vm2159_vm6, %v3891_v56, %v2160_v3  ;;  %v3006_v47 = vsel %vm3004_vm9, %v3891_v56, %v2160_v3 }
 0x5de   : > { %v2239_v58 = vsub.s32 32, %v2238_v1  ;;  %v2313_v14 = vsel %vm2303_vm13, %v2310_v43, %v2312_v53  ;;  %v2165_v49 = vsel %vm2158_vm10, %v2161_v19, %v2164_v17  ;;  %v3010_v15 = vsel %vm3003_vm11, %v3006_v47, %v3009_v10 }
 0x5df   : > { %v2243_v2 = vsub.s32 4294967266, %v2238_v1  ;;  %v2317_v23 = vsel %vm2303_vm13, %v2314_v37, %v2316_v30  ;;  %v2166_v9 = vsel %vm2156_vm8, nan, %v2165_v49  ;;  %v3011_v4 = vsel %vm2156_vm8, nan, %v3010_v15 }
 0x5e0   : > { %v2240_v24 = vshll.u32 %v5244_v22, %v2238_v1  ;;  %v2241_v60 = vshrl.u32 %v2223_v26, %v2239_v58  ;;  %v2480_v5 = vmul.f32 %v2166_v9, %v5237_v52  ;;  %v3328_v31 = vmul.f32 %v3011_v4, %v5237_v52 }
 0x5e1   : > { %v2244_v20 = vadd.s32 127, %v2243_v2  ;;  %v2376_v50 = vand.u32 2139095040, %v5269_v51  ;;  %v2308_v18 = vsel %vm2304_vm15, %v2292_v0, %v2307_v33  ;;  %vm5331_vm2 = vcmp.le.f32.partialorder %v2167_v48, 0.7853982 }
 0x5e2   : > { %v2242_v32 = vor.u32 %v2241_v60, %v2240_v24  ;;  %v5319_v12 = vmul.u32.u64.low %v5274_v59, %v2317_v23  ;;  %v5320_v6 = vmul.u32.u64.high %v5274_v59, %v2317_v23, %v5319_v12  ;;  %2488 = vst [vmem:[%s4951_s16 + $0x20] sm:$0xff] %v2480_v5  ;;  %3336 = vst [vmem:[%s4955_s0 + $0x20] sm:$0xff] %v3328_v31  ;;  %v2309_v57 = vsel %vm2303_vm13, %v2306_v63, %v2308_v18 }
 0x5e3   : > { %v2245_v8 = vshll.u32 %v2244_v20, 23  ;;  %v5325_v22 = vmul.u32.u64.low %v5274_v59, %v2313_v14  ;;  %v5326_v7 = vmul.u32.u64.high %v5274_v59, %v2313_v14, %v5325_v22  ;;  %v2377_v52 = vshrl.u32 %v2376_v50, 23  ;;  %v3916_v50 = vld [vmem:[%s4343_s17 + $0x28] sm:$0xff] }
 0x5e4   : > { %v2256_v36 = vsel %vm5331_vm2, 0, %v2254_v11  ;;  %v2249_v56 = vcvt.s32.f32 %v2242_v32  ;;  %v2325_v48 = vmul.u32 %v5274_v59, %v2309_v57  ;;  %v2373_v11 = vand.u32 2147483647, %v5269_v51 }
 0x5e5   : > { %v2246_v0 = vor.u32 4788187, %v2245_v8  ;;  %v3580_v26 = vadd.s32 4294967169, %v2377_v52  ;;  %vm2327_vm3 = vc.u32 %v5320_v6, %v5325_v22  ;;  %v2328_v28 = vadd.s32 1, %v5326_v7 }
 0x5e6   : > { %v3105_v44 = vadd.s32 3, %v2256_v36  ;;  %v1091_v37 = vadd.f32 %v4605_v38, %v5126_v13  ;;  %v5352_v10 = vand.u32 3, %v2256_v36  ;;  %v2380_v19 = vand.u32 8388607, %v2373_v11 }
 0x5e7   : > { %v2247_v54 = vand.u32 2147483647, %v2246_v0  ;;  %v2383_v25 = vadd.s32 1, %v3580_v26  ;;  %v2329_v55 = vsel %vm2327_vm3, %v2328_v28, %v5326_v7  ;;  %vm2259_vm9 = vweird.f32 %v5019_v42 }
 0x5e8   : > { %v2330_v63 = vadd.s32 %v2329_v55, %v2325_v48  ;;  %v5354_v1 = vand.u32 3, %v3105_v44  ;;  %v1104_v32 = vadd.f32 %v3916_v50, %v1091_v37  ;;  %vm2262_vm7 = vcmp.eq.s32.totalorder %v5352_v10, 0 }
 0x5e9   : > { %v2250_v62 = vmul.f32 %v2249_v56, %v2247_v54  ;;  %vm2384_vm5 = vcmp.gt.s32.totalorder %v2383_v25, 0  ;;  %vm2265_vm6 = vcmp.eq.s32.totalorder %v5352_v10, 2  ;;  %v2326_v0 = vadd.s32 %v5325_v22, %v5320_v6 }
 0x5ea   : > { %v2385_v43 = vsel %vm2384_vm5, %v2383_v25, 0  ;;  %v2331_v3 = vadd.s32 536870912, %v2330_v63  ;;  %vm3107_vm10 = vcmp.lt.s32.totalorder %v5354_v1, 2  ;;  %vm3108_vm8 = vcmp.eq.s32.totalorder %v5354_v1, 0 }
 0x5eb   : > { %v2251_v53 = vxor.u32 2147483648, %v2250_v62  ;;  %v2387_v61 = vand.u32 31, %v2385_v43  ;;  %v5363_v58 = vshrl.u32 %v2385_v43, 5  ;;  %vm3111_vm13 = vcmp.eq.s32.totalorder %v5354_v1, 2 }
 0x5ec   : > { %v5356_v33 = vshrl.u32 %v2331_v3, 30  ;;  %vm2271_vm3 = vcmp.le.f32.partialorder %v2270_v16, 0.7853982 }
 0x5ed   : > { %v2252_v30 = vsel %vm2169_vm4, %v2251_v53, %v2250_v62  ;;  %v2388_v17 = vsub.s32 32, %v2387_v61  ;;  %v2390_v49 = vshll.u32 %v4091_v21, %v2387_v61  ;;  %v2393_v15 = vshll.u32 %v4092_v45, %v2387_v61 }
 0x5ee   : > { %v2255_v59 = vsel %vm5331_vm2, %v5019_v42, %v2252_v30  ;;  %v2333_v47 = vshll.u32 %v5356_v33, 30  ;;  %v2399_v2 = vshll.u32 %v4094_v35, %v2387_v61  ;;  %v2396_v4 = vshll.u32 %v4093_v27, %v2387_v61 }
 0x5ef   : > { %3894 = vcosq.f32 %v2255_v59  ;;  %v2391_v38 = vshrl.u32 %v4092_v45, %v2388_v17  ;;  %v2394_v13 = vshrl.u32 %v4093_v27, %v2388_v17  ;;  %v2397_v14 = vshrl.u32 %v4094_v35, %v2388_v17 }
 0x5f0   : > { %3896 = vsinq.f32 %v2255_v59  ;;  %v2400_v23 = vshrl.u32 %v4095_v29, %v2388_v17  ;;  %v5370_v9 = vsub.s32 %v2330_v63, %v2333_v47  ;;  %v2402_v24 = vshll.u32 %v4095_v29, %v2387_v61 }
 0x5f1   : > { %v2403_v60 = vshrl.u32 %v4096_v41, %v2388_v17  ;;  %v2392_v5 = vor.u32 %v2391_v38, %v2390_v49  ;;  %v2395_v31 = vor.u32 %v2394_v13, %v2393_v15  ;;  %v2398_v45 = vor.u32 %v2397_v14, %v2396_v4 }
 0x5f2   : > { %v2401_v20 = vor.u32 %v2400_v23, %v2399_v2  ;;  %v2336_v18 = vsub.s32 0, %v5370_v9  ;;  %vm2261_vm4 = vcmp.lt.s32.totalorder %v5352_v10, 2  ;;  %v2381_v27 = vor.u32 8388608, %v2380_v19 }
 0x5f3   : > { %v2404_v12 = vor.u32 %v2403_v60, %v2402_v24  ;;  %vm2405_vm11 = vcmp.lt.s32.totalorder %v5363_v58, 1  ;;  %vm2408_vm0 = vcmp.lt.s32.totalorder %v5363_v58, 4  ;;  %vm2407_vm12 = vcmp.lt.s32.totalorder %v5363_v58, 3 }
 0x5f4   : > { %v3577_v35 = vmin.u32 %v2336_v18, %v5370_v9  ;;  %v2413_v29 = vsel %vm2405_vm11, %v2392_v5, %v2395_v31  ;;  %v2414_v41 = vsel %vm2408_vm0, %v2401_v20, 920167782  ;;  %v2389_v57 = vshrl.u32 %v4091_v21, %v2388_v17 }
 0x5f5   : > { %v2415_v7 = vsel %vm2407_vm12, %v2398_v45, %v2414_v41  ;;  %v2418_v52 = vsel %vm2408_vm0, %v2404_v12, 1326507024  ;;  %vm2406_vm14 = vcmp.lt.s32.totalorder %v5363_v58, 2  ;;  %v2421_v26 = vshll.u32 %v2381_v27, 8 }
 0x5f6   : > { %v2338_v8 = vclz %v3577_v35  ;;  %v2416_v28 = vsel %vm2406_vm14, %v2413_v29, %v2415_v7  ;;  %v2417_v25 = vsel %vm2405_vm11, %v2395_v31, %v2398_v45  ;;  %v2419_v62 = vsel %vm2407_vm12, %v2401_v20, %v2418_v52 }
 0x5f7   : > { %v5406_v55 = vmul.u32.u64.low %v2421_v26, %v2416_v28  ;;  %v5407_v6 = vmul.u32.u64.high %v2421_v26, %v2416_v28, %v5406_v55  ;;  %v2410_v44 = vsel %vm2408_vm0, %v2398_v45, 2102212464  ;;  %v2409_v61 = vsel %vm2405_vm11, %v2389_v57, %v2392_v5 }
 0x5f8   : > { %v3578_v56 = vadd.s32 4294967294, %v2338_v8  ;;  %v2420_v17 = vsel %vm2406_vm14, %v2417_v25, %v2419_v62  ;;  %v2411_v13 = vsel %vm2407_vm12, %v2395_v31, %v2410_v44  ;;  %vm2272_vm2 = vcmp.lt.s32.totalorder %v5136_v34, 0 }
 0x5f9   : > { %v3895_v46 = vpop.eup %3894  ;;  %v5435_v15 = vmul.u32.u64.low %v2421_v26, %v2420_v17  ;;  %v5436_v2 = vmul.u32.u64.high %v2421_v26, %v2420_v17, %v5435_v15  ;;  %v2412_v23 = vsel %vm2406_vm14, %v2409_v61, %v2411_v13  ;;  %v2431_v42 = vadd.s32 1, %v5407_v6 }
 0x5fa   : > { %v3897_v36 = vpop.eup %3896  ;;  %v2266_v54 = vxor.u32 2147483648, %v3895_v46  ;;  %vm3579_vm15 = vcmp.lt.s32.totalorder %v3578_v56, 0  ;;  %v2428_v5 = vmul.u32 %v2421_v26, %v2412_v23  ;;  %vm2362_vm0 = vweird.f32 %v5136_v34 }
 0x5fb   : > { %v2263_v48 = vxor.u32 2147483648, %v3897_v36  ;;  %v2341_v53 = vsel %vm3579_vm15, 0, %v3578_v56  ;;  %vm2430_vm1 = vc.u32 %v5436_v2, %v5406_v55  ;;  %vm2374_vm12 = vcmp.le.f32.partialorder %v2373_v11, 0.7853982 }
 0x5fc   : > { %v2267_v21 = vsel %vm2265_vm6, %v2266_v54, %v3897_v36  ;;  %v3113_v22 = vsel %vm3111_vm13, %v2266_v54, %v3897_v36  ;;  %v2342_v30 = vsub.s32 32, %v2341_v53  ;;  %v2346_v38 = vsub.s32 4294967266, %v2341_v53  ;;  %v996_v54 = vpop.permute.xlu1 %995 }
 0x5fd   : > { %v2264_v63 = vsel %vm2262_vm7, %v3895_v46, %v2263_v48  ;;  %v3110_v43 = vsel %vm3108_vm8, %v3895_v46, %v2263_v48  ;;  %v2343_v1 = vshll.u32 %v5370_v9, %v2341_v53  ;;  %v2432_v9 = vsel %vm2430_vm1, %v2431_v42, %v5407_v6 }
 0x5fe   : > { %v2268_v3 = vsel %vm2261_vm4, %v2264_v63, %v2267_v21  ;;  %v3114_v37 = vsel %vm3107_vm10, %v3110_v43, %v3113_v22  ;;  %v2344_v14 = vshrl.u32 %v2326_v0, %v2342_v30  ;;  %v2347_v49 = vadd.s32 127, %v2346_v38 }
 0x5ff   : > { %v2269_v59 = vsel %vm2259_vm9, nan, %v2268_v3  ;;  %v3115_v19 = vsel %vm2259_vm9, nan, %v3114_v37  ;;  %v2433_v50 = vadd.s32 %v2432_v9, %v2428_v5  ;;  %v1095_v56 = vadd.f32 %v4607_v39, %v996_v54  ;;  %v3917_v37 = vld [vmem:[%s4343_s17 + $0x30] sm:$0xff] }
 0x600   : > { %v2481_v10 = vmul.f32 %v2269_v59, %v1104_v32  ;;  %v3329_v47 = vmul.f32 %v3115_v19, %v1104_v32  ;;  %v2345_v4 = vor.u32 %v2344_v14, %v2343_v1  ;;  %v2348_v24 = vshll.u32 %v2347_v49, 23 }
 0x601   : > { %v2356_v32 = vsub.s32 4, %v5356_v33  ;;  %v2434_v45 = vadd.s32 536870912, %v2433_v50  ;;  %v2429_v6 = vadd.s32 %v5406_v55, %v5436_v2  ;;  %v1105_v30 = vadd.f32 %v3917_v37, %v1095_v56 }
 0x602   : > { %2489 = vst [vmem:[%s4951_s16 + $0x28] sm:$0xff] %v2481_v10  ;;  %3337 = vst [vmem:[%s4955_s0 + $0x28] sm:$0xff] %v3329_v47  ;;  %v2349_v60 = vor.u32 4788187, %v2348_v24  ;;  %v2352_v20 = vcvt.s32.f32 %v2345_v4  ;;  %vm2375_vm8 = vcmp.lt.s32.totalorder %v5269_v51, 0 }
 0x603   : > { %v5448_v12 = vshrl.u32 %v2434_v45, 30  ;;  %v2357_v27 = vsel %vm2272_vm2, %v2356_v32, %v5356_v33 }
 0x604   : > { %v2350_v31 = vand.u32 2147483647, %v2349_v60  ;;  %v2359_v8 = vsel %vm2271_vm3, 0, %v2357_v27  ;;  %v3918_v27 = vld [vmem:[%s4343_s17 + $0x38] sm:$0xff] }
 0x605   : > { %v2436_v29 = vshll.u32 %v5448_v12, 30  ;;  %v3209_v46 = vadd.s32 3, %v2359_v8  ;;  %v2363_v57 = vand.u32 3, %v2359_v8  ;;  %v2459_v2 = vsub.s32 4, %v5448_v12 }
 0x606   : > { %v2353_v18 = vmul.f32 %v2352_v20, %v2350_v31 }
 0x607   : > { %v2437_v7 = vsub.s32 %v2433_v50, %v2436_v29  ;;  %v3210_v36 = vand.u32 3, %v3209_v46  ;;  %vm2364_vm5 = vcmp.lt.s32.totalorder %v2363_v57, 2  ;;  %vm2365_vm4 = vcmp.eq.s32.totalorder %v2363_v57, 0 }
 0x608   : > { %v2354_v58 = vxor.u32 2147483648, %v2353_v18  ;;  %vm2368_vm7 = vcmp.eq.s32.totalorder %v2363_v57, 2  ;;  %v2460_v42 = vsel %vm2375_vm8, %v2459_v2, %v5448_v12  ;;  %v1097_v50 = vadd.f32 %v4609_v40, %v996_v54 }
 0x609   : > { %v2439_v52 = vsub.s32 0, %v2437_v7  ;;  %vm3211_vm9 = vcmp.lt.s32.totalorder %v3210_v36, 2  ;;  %vm3215_vm10 = vcmp.eq.s32.totalorder %v3210_v36, 2  ;;  %vm3212_vm11 = vcmp.eq.s32.totalorder %v3210_v36, 0 }
 0x60a   : > { %v2355_v35 = vsel %vm2272_vm2, %v2354_v58, %v2353_v18  ;;  %v2462_v24 = vsel %vm2374_vm12, 0, %v2460_v42  ;;  %v1106_v40 = vadd.f32 %v3918_v27, %v1097_v50 }
 0x60b   : > { %v2358_v41 = vsel %vm2271_vm3, %v5136_v34, %v2355_v35  ;;  %v3581_v0 = vmin.u32 %v2439_v52, %v2437_v7  ;;  %v3313_v60 = vadd.s32 3, %v2462_v24  ;;  %v2466_v5 = vand.u32 3, %v2462_v24 }
 0x60c   : > { %3898 = vcosq.f32 %v2358_v41 }
 0x60d   : > { %3900 = vsinq.f32 %v2358_v41  ;;  %v2441_v26 = vclz %v3581_v0  ;;  %v3314_v9 = vand.u32 3, %v3313_v60  ;;  %vm2471_vm13 = vcmp.eq.s32.totalorder %v2466_v5, 2 }
 0x60e   : > { %vm2468_vm15 = vcmp.eq.s32.totalorder %v2466_v5, 0  ;;  %vm2467_vm2 = vcmp.lt.s32.totalorder %v2466_v5, 2 }
 0x60f   : > { %v3582_v33 = vadd.s32 4294967294, %v2441_v26  ;;  %vm3319_vm14 = vcmp.eq.s32.totalorder %v3314_v9, 2  ;;  %vm3316_vm1 = vcmp.eq.s32.totalorder %v3314_v9, 0  ;;  %vm3315_vm3 = vcmp.lt.s32.totalorder %v3314_v9, 2 }
 0x611   : > { %vm3583_vm6 = vcmp.lt.s32.totalorder %v3582_v33, 0 }
 0x612   : > { %v2444_v48 = vsel %vm3583_vm6, 0, %v3582_v33 }
 0x613   : > { %v2445_v21 = vsub.s32 32, %v2444_v48  ;;  %v2449_v22 = vsub.s32 4294967266, %v2444_v48  ;;  %v2446_v63 = vshll.u32 %v2437_v7, %v2444_v48 }
 0x615   : > { %v2447_v61 = vshrl.u32 %v2429_v6, %v2445_v21  ;;  %v2450_v3 = vadd.s32 127, %v2449_v22 }
 0x616   : > { %v3899_v16 = vpop.eup %3898 }
 0x617   : > { %v3901_v28 = vpop.eup %3900  ;;  %v2369_v25 = vxor.u32 2147483648, %v3899_v16  ;;  %v2448_v38 = vor.u32 %v2447_v61, %v2446_v63  ;;  %v2451_v13 = vshll.u32 %v2450_v3, 23 }
 0x618   : > { %v2366_v62 = vxor.u32 2147483648, %v3901_v28 }
 0x619   : > { %v2370_v44 = vsel %vm2368_vm7, %v2369_v25, %v3901_v28  ;;  %v3217_v39 = vsel %vm3215_vm10, %v2369_v25, %v3901_v28  ;;  %v2452_v14 = vor.u32 4788187, %v2451_v13  ;;  %v2455_v49 = vcvt.s32.f32 %v2448_v38 }
 0x61a   : > { %v2367_v43 = vsel %vm2365_vm4, %v3899_v16, %v2366_v62  ;;  %v3214_v53 = vsel %vm3212_vm11, %v3899_v16, %v2366_v62 }
 0x61b   : > { %v2371_v17 = vsel %vm2364_vm5, %v2367_v43, %v2370_v44  ;;  %v3218_v55 = vsel %vm3211_vm9, %v3214_v53, %v3217_v39  ;;  %v2453_v1 = vand.u32 2147483647, %v2452_v14  ;;  %vm2465_vm5 = vweird.f32 %v5269_v51 }
 0x61c   : > { %v2372_v59 = vsel %vm2362_vm0, nan, %v2371_v17  ;;  %v3219_v19 = vsel %vm2362_vm0, nan, %v3218_v55 }
 0x61d   : > { %v2482_v10 = vmul.f32 %v2372_v59, %v1105_v30  ;;  %v3330_v47 = vmul.f32 %v3219_v19, %v1105_v30  ;;  %v2456_v15 = vmul.f32 %v2455_v49, %v2453_v1 }
 0x61f   : > { %2490 = vst [vmem:[%s4951_s16 + $0x30] sm:$0xff] %v2482_v10  ;;  %3338 = vst [vmem:[%s4955_s0 + $0x30] sm:$0xff] %v3330_v47  ;;  %v2457_v23 = vxor.u32 2147483648, %v2456_v15 }
 0x621   : > { %v2458_v34 = vsel %vm2375_vm8, %v2457_v23, %v2456_v15 }
 0x622   : > { %v2461_v4 = vsel %vm2374_vm12, %v5269_v51, %v2458_v34 }
 0x623   : > { %3902 = vcosq.f32 %v2461_v4 }
 0x624   : > { %3904 = vsinq.f32 %v2461_v4 }
 0x62d   : > { %v3903_v31 = vpop.eup %3902 }
 0x62e   : > { %v3905_v20 = vpop.eup %3904  ;;  %v2472_v32 = vxor.u32 2147483648, %v3903_v31 }
 0x62f   : > { %v2469_v11 = vxor.u32 2147483648, %v3905_v20 }
 0x630   : > { %v2473_v18 = vsel %vm2471_vm13, %v2472_v32, %v3905_v20  ;;  %v3321_v45 = vsel %vm3319_vm14, %v2472_v32, %v3905_v20 }
 0x631   : > { %v2470_v58 = vsel %vm2468_vm15, %v3903_v31, %v2469_v11  ;;  %v3318_v12 = vsel %vm3316_vm1, %v3903_v31, %v2469_v11 }
 0x632   : > { %v2474_v35 = vsel %vm2467_vm2, %v2470_v58, %v2473_v18  ;;  %v3322_v29 = vsel %vm3315_vm3, %v3318_v12, %v3321_v45 }
 0x633   : > { %v2475_v41 = vsel %vm2465_vm5, nan, %v2474_v35  ;;  %v3323_v8 = vsel %vm2465_vm5, nan, %v3322_v29 }
 0x634   : > { %v2483_v7 = vmul.f32 %v2475_v41, %v1106_v40  ;;  %v3331_v52 = vmul.f32 %v3323_v8, %v1106_v40 }
 0x636   : > { %2491 = vst [vmem:[%s4951_s16 + $0x38] sm:$0xff] %v2483_v7  ;;  %3339 = vst [vmem:[%s4955_s0 + $0x38] sm:$0xff] %v3331_v52 }
 0x637   : > { %3990 = shalt.err (!%p3987_p9)
}
 0x638   : > { %s3991_s16 = scalar_lea.hbm %s5479_s6, 1024  ;;  %s3995_s2 = scalar_lea.hbm %s5638_s7, 2048 }
 0x639   : > { %p3992_p2 = scmp.ne.s32.totalorder %s5479_s6, %s3991_s16  ;;  %p3996_p11 = scmp.lt.u32.totalorder %s5479_s6, %s5638_s7 }
 0x63a   : > { %p3997_p1 = scmp.lt.u32.totalorder %s3995_s2, %s3991_s16  ;;  %p3999_p6 = scmp.lt.u32.totalorder %s3991_s16, %s5479_s6 }
 0x63b   : > { %p3993_p0 = pnand %p3992_p2, %p4272_p12 }
 0x63c   : > { %p3998_p4 = por %p3997_p1, %p3996_p11 }
 0x63d   : > { %p3994_p5 = pneg %p3993_p0 }
 0x63e   : > { %p4000_p8 = por %p3999_p6, %p3998_p4 }
 0x640   : > { %p4001_p10 = pnand %p4000_p8, %p3994_p5 }
 0x642   : > { %4004 = shalt.err (!%p4001_p10)
}
 0x643   : > { %s4098_s4 = smov 256   ;;  %s4099_s26 = smov 16  }
 0x644   : > { %3768 = dma.vmem_to_hbm [thread:$0]  (%p4272_p12), %s5482_s28, 1024, %s5479_s6, %s3341_s22, %s4098_s4, %s4098_s4, %s4099_s26  }
 0x645   : > { %s3346_s1 = scalar_lea.sflag [#allocation9], %s4320_s27  ;;  %s4005_s16 = scalar_lea.vmem %s5489_s18, 1024 }
 0x646   : > { %p4006_p13 = scmp.ne.s32.totalorder %s5489_s18, %s4005_s16  ;;  %s4100_s0 = smov [#allocation8]  }
 0x647   : > { %s4009_s29 = sshll.u32 %s4100_s0, 4  ;;  %s4010_s29 = int_to_ptr.vmem [resolvable:$false] %s4009_s29 }
 0x648   : > { %p4007_p3 = pnand %p4006_p13, %p4272_p12  ;;  %s4011_s2 = scalar_lea.vmem %s4010_s29, 2048 }
 0x649   : > { %p4012_p9 = scmp.lt.s32.totalorder %s5489_s18, %s4010_s29  ;;  %p4013_p2 = scmp.lt.s32.totalorder %s4011_s2, %s4005_s16 }
 0x64a   : > { %p4008_p7 = pneg %p4007_p3 }
 0x64b   : > { %p4014_p0 = por %p4013_p2, %p4012_p9 }
 0x64d   : > { %p4015_p5 = pnand %p4014_p0, %p4008_p7 }
 0x64f   : > { %4018 = shalt.err (!%p4015_p5)
}
 0x650   : > { %s4019_s28 = scalar_lea.hbm %s5487_s24, 1024  ;;  %s4023_s17 = scalar_lea.hbm %s5639_s14, 2048 }
 0x651   : > { %p4020_p11 = scmp.ne.s32.totalorder %s5487_s24, %s4019_s28  ;;  %p4024_p6 = scmp.lt.u32.totalorder %s5487_s24, %s5639_s14 }
 0x652   : > { %p4025_p8 = scmp.lt.u32.totalorder %s4023_s17, %s4019_s28  ;;  %p4027_p13 = scmp.lt.u32.totalorder %s4019_s28, %s5487_s24 }
 0x653   : > { %p4021_p1 = pnand %p4020_p11, %p4272_p12 }
 0x654   : > { %p4026_p10 = por %p4025_p8, %p4024_p6 }
 0x655   : > { %p4022_p4 = pneg %p4021_p1 }
 0x656   : > { %p4028_p3 = por %p4027_p13, %p4026_p10 }
 0x658   : > { %p4029_p7 = pnand %p4028_p3, %p4022_p4 }
 0x65a   : > { %4032 = shalt.err (!%p4029_p7)
}
 0x65b   : > { %3769 = dma.vmem_to_hbm [thread:$0]  (%p4272_p12), %s5489_s18, 1024, %s5487_s24, %s3346_s1, %s4098_s4, %s4098_s4, %s4099_s26  }
 0x65c PF: > { %s5640_s16 = sld [smem:[#allocation14_spill]]  ;;  %s5641_s29 = sld [smem:[#allocation15_spill]] }
 0x65d   : > { %p5643_p2 = scmp.ge.s32.totalorder %s4079_s21, 2 }
 0x662   : > { %s3390_s2 = sand.u32 1, %s5640_s16   ;;  %p5642_p9 = scmp.ne.s32.totalorder %s5641_s29, 0 }
 0x663   : > { %s3391_s28 = scalar_lea.sflag [#allocation4], %s3390_s2 }
 0x664   : > { %p3781_p0 = pnand %p5643_p2, %p5642_p9 }
 0x666   : > { %4058 = dma.done.wait (!%p3781_p0), %s3391_s28, 1024  }
 0x667   : > { %4060 = vsyncadd (!%p3781_p0), %s3391_s28, 4294966272  ;;  %s3400_s30 = scalar_lea.sflag [#allocation9], %s3390_s2 }
 0x668   : > { %4062 = dma.done.wait (!%p3781_p0), %s3400_s30, 1024  }
 0x669   : > { %4064 = vsyncadd (!%p3781_p0), %s3400_s30, 4294966272  ;;  %s5644_s21 = sld [smem:[#allocation16_spill]]  ;;  %s5645_s18 = smov %s4071_s19 }
 0x66a   : > { %s5646_s19 = smov %s4075_s20  ;;  %s5647_s20 = smov %s4268_s25 }
 0x66f   : > { %p33_p12 = scmp.ge.s32.totalorder %s5644_s21, 4  }
 0x671   :  { %35 = sbr.rel (!%p33_p12) target bundleno = 19 (0x13), region = 145 }
 0x678   :  { %3405 = vsyncpa [#allocation3], 1 }
 0x679   :  { %3407 = vsyncpa [#allocation3 + $0x1], 1 }
 0x67a   :  { %3408 = vsyncpa [#allocation6], 1 }
 0x67b   :  { %3409 = vsyncpa [#allocation4], 1 }
 0x67c   :  { %3411 = vsyncpa [#allocation4 + $0x1], 1 }
 0x67d   :  { %3412 = vsyncpa [#allocation9], 1 }
 0x67e   :  { %3414 = vsyncpa [#allocation9 + $0x1], 1 }

</bundles_post_ra>
